<compile_context>
chip_gen: v7x
topology: tpu7x:2x2x1
jax: 0.10.0
libtpu: 0.0.40
codegen_flags: <defaults>
</compile_context>

<pallas_src>
import jax
import jax.numpy as jnp
from jax.experimental import pallas as pl
from jax.experimental.pallas import tpu as pltpu


def _round_up(x, m):
    return (x + m - 1) // m * m


def _make_kernel(KH, KW, TH, W_out_pad, dh, dw, Cp_in, Cp_out):
    def kernel(x_ref, w_ref, b_ref, o_ref):
        # x_ref: (1, 1, TH_in, W_pad_ext, Cp_in)  native dtype (halo row tile)
        # w_ref: (KH*KW*Cp_in, Cp_out)            native dtype
        # b_ref: (1, Cp_out)                      f32
        # o_ref: (1, TH, W_out_pad, Cp_out)       native dtype
        taps = []
        for kh in range(KH):
            h0 = kh * dh
            for kw in range(KW):
                w0 = kw * dw
                taps.append(x_ref[0, 0, h0:h0 + TH, w0:w0 + W_out_pad, :])
        # im2col on the lane axis: every piece is a multiple of 128 lanes and
        # W_out_pad % 8 == 0, so the concat and the reshapes are layout-free.
        lhs = jnp.concatenate(taps, axis=-1).reshape(TH * W_out_pad,
                                                     KH * KW * Cp_in)
        # One MXU matmul, native-dtype operands, f32 accumulation.
        acc = jnp.dot(lhs, w_ref[...], preferred_element_type=jnp.float32)
        out = (acc + b_ref[...]).reshape(TH, W_out_pad, Cp_out)
        o_ref[0] = out.astype(o_ref.dtype)

    return kernel


def complex_conv2d(x, w_re, b_re, w_im, b_im,
                   stride=(1, 1), padding=(0, 0), dilation=(1, 1),
                   tile_h=None):
    """x: (B, Cin, H, W, 2). Weights in PyTorch OIHW layout. groups=1, bias=True."""
    B, Cin, H, W, two = x.shape
    assert two == 2
    Cout, Cin_w, KH, KW = w_re.shape
    assert Cin_w == Cin and w_im.shape == w_re.shape
    sh, sw = stride
    ph, pw = padding
    dh, dw = dilation
    # TODO(synk): stride > 1 via wrapper-side row/col pre-decimation.
    assert (sh, sw) == (1, 1), "Pallas path currently requires stride == (1, 1)"

    H_out = (H + 2 * ph - dh * (KH - 1) - 1) // sh + 1
    W_out = (W + 2 * pw - dw * (KW - 1) - 1) // sw + 1
    dtype = x.dtype
    itemsize = jnp.dtype(dtype).itemsize

    # Lane-dense channel padding and sublane-clean output width.
    Cp_in = _round_up(2 * Cin, 128)
    Cp_out = _round_up(2 * Cout, 128)
    W_out_pad = _round_up(W_out, 8)
    W_pad_ext = W + 2 * pw + (W_out_pad - W_out)

    # --- generation-aware tile-height / VMEM budget ---------------------------
    try:
        vmem_cap = pltpu.get_tpu_info().vmem_capacity_bytes
    except Exception:
        vmem_cap = 64 * 1024 * 1024          # conservative: v7x per-core VMEM
    budget = int(vmem_cap * 0.6)

    w_bytes = KH * KW * Cp_in * Cp_out * itemsize
    b_bytes = Cp_out * 4

    def vmem_estimate(th):
        th_in = th + (KH - 1) * dh
        in_tile = th_in * W_pad_ext * Cp_in * itemsize
        out_tile = th * W_out_pad * Cp_out * itemsize
        lhs_val = th * W_out_pad * KH * KW * Cp_in * itemsize   # im2col value
        acc_val = th * W_out_pad * Cp_out * 4                   # f32 result
        # inputs/outputs are double-buffered by the BlockSpec pipeline
        return 2 * (in_tile + out_tile + w_bytes + b_bytes) + lhs_val + acc_val

    if tile_h is None:
        TH = min(H_out, 256)
        while TH > 8 and vmem_estimate(TH) > budget:
            TH = -(-TH // 2)
    else:
        TH = min(tile_h, H_out)
    n_h = -(-H_out // TH)
    H_out_ext = n_h * TH
    TH_in = TH + (KH - 1) * dh
    vmem_limit = int(min(vmem_cap * 0.9,
                         max(vmem_estimate(TH) * 1.5, 8 * 1024 * 1024)))

    # --- layout in: NCHW2 -> NHWC with [re | im | zero-pad] channels ----------
    x_cat = jnp.concatenate([x[..., 0], x[..., 1]], axis=1)      # (B, 2Cin, H, W)
    x_nhwc = jnp.transpose(x_cat, (0, 2, 3, 1))                  # (B, H, W, 2Cin)
    extra_h = H_out_ext - H_out
    extra_w = W_out_pad - W_out
    x_padded = jnp.pad(
        x_nhwc,
        ((0, 0), (ph, ph + extra_h), (pw, pw + extra_w), (0, Cp_in - 2 * Cin)))
    # Overlapping (halo) row tiles -> plain non-overlapping BlockSpec blocks.
    row_idx = (jnp.arange(n_h) * TH)[:, None] + jnp.arange(TH_in)[None, :]
    x_tiles = x_padded[:, row_idx]           # (B, n_h, TH_in, W_pad_ext, Cp_in)

    # --- block-structured complex weight, padded to (KH*KW*Cp_in, Cp_out) -----
    wr = jnp.transpose(w_re, (2, 3, 1, 0))                  # (KH, KW, Cin, Cout)
    wi = jnp.transpose(w_im, (2, 3, 1, 0))
    top = jnp.concatenate([wr, wi], axis=-1)                # rows fed by x_re
    bot = jnp.concatenate([-wi, wr], axis=-1)               # rows fed by x_im
    w_blk = jnp.concatenate([top, bot], axis=2)             # (KH, KW, 2Cin, 2Cout)
    w_blk = jnp.pad(w_blk, ((0, 0), (0, 0),
                            (0, Cp_in - 2 * Cin), (0, Cp_out - 2 * Cout)))
    w_flat = w_blk.reshape(KH * KW * Cp_in, Cp_out).astype(dtype)

    b_cat = jnp.concatenate([b_re - b_im, b_re + b_im])
    b_pad = jnp.pad(b_cat, (0, Cp_out - 2 * Cout)).reshape(1, Cp_out)
    b_pad = b_pad.astype(jnp.float32)

    kernel = _make_kernel(KH, KW, TH, W_out_pad, dh, dw, Cp_in, Cp_out)

    flops = 2 * B * n_h * TH * W_out_pad * (KH * KW * Cp_in) * Cp_out
    bytes_accessed = (B * n_h * TH_in * W_pad_ext * Cp_in
                      + KH * KW * Cp_in * Cp_out
                      + B * H_out_ext * W_out_pad * Cp_out) * itemsize + Cp_out * 4

    out_full = pl.pallas_call(
        kernel,
        out_shape=jax.ShapeDtypeStruct((B, H_out_ext, W_out_pad, Cp_out), dtype),
        grid_spec=pltpu.PrefetchScalarGridSpec(
            num_scalar_prefetch=0,
            grid=(B, n_h),
            in_specs=[
                pl.BlockSpec((1, 1, TH_in, W_pad_ext, Cp_in),
                             lambda b, h: (b, h, 0, 0, 0)),
                # Constant index maps: fetched once, stay resident across grid.
                pl.BlockSpec((KH * KW * Cp_in, Cp_out), lambda b, h: (0, 0)),
                pl.BlockSpec((1, Cp_out), lambda b, h: (0, 0)),
            ],
            out_specs=pl.BlockSpec((1, TH, W_out_pad, Cp_out),
                                   lambda b, h: (b, h, 0, 0)),
        ),
        compiler_params=pltpu.CompilerParams(
            dimension_semantics=("parallel", "parallel"),
            vmem_limit_bytes=vmem_limit,
        ),
        cost_estimate=pl.CostEstimate(flops=flops, transcendentals=0,
                                      bytes_accessed=bytes_accessed),
    )(x_tiles, w_flat, b_pad)

    # --- layout out: (B, Ho_ext, Wo_pad, [re|im|pad]) -> (B, Cout, Ho, Wo, 2) --
    out = out_full[:, :H_out, :W_out, :2 * Cout]
    out = jnp.transpose(out, (0, 3, 1, 2))                   # (B, 2Cout, Ho, Wo)
    real, imag = out[:, :Cout], out[:, Cout:]
    return jnp.stack([real, imag], axis=-1)


def _reference(x, w_re, b_re, w_im, b_im, stride, padding, dilation):
    def conv(xc, w, b):
        y = jax.lax.conv_general_dilated(
            xc, w,
            window_strides=stride,
            padding=[(padding[0], padding[0]), (padding[1], padding[1])],
            rhs_dilation=dilation,
            dimension_numbers=("NCHW", "OIHW", "NCHW"),
            precision=jax.lax.Precision.HIGHEST)
        return y + b[None, :, None, None]

    x_re, x_im = x[..., 0], x[..., 1]
    real = conv(x_re, w_re, b_re) - conv(x_im, w_im, b_im)
    imag = conv(x_im, w_re, b_re) + conv(x_re, w_im, b_im)
    return jnp.stack([real, imag], axis=-1)


if __name__ == "__main__":
    key = jax.random.PRNGKey(0)
    B, Cin, Cout, H, W = 2, 4, 8, 16, 16
    KH = KW = 3
    stride, padding, dilation = (1, 1), (1, 1), (1, 1)

    ks = jax.random.split(key, 5)
    x = jax.random.normal(ks[0], (B, Cin, H, W, 2), dtype=jnp.float32)
    w_re = 0.1 * jax.random.normal(ks[1], (Cout, Cin, KH, KW), dtype=jnp.float32)
    w_im = 0.1 * jax.random.normal(ks[2], (Cout, Cin, KH, KW), dtype=jnp.float32)
    b_re = 0.1 * jax.random.normal(ks[3], (Cout,), dtype=jnp.float32)
    b_im = 0.1 * jax.random.normal(ks[4], (Cout,), dtype=jnp.float32)

    # tile_h=8 exercises the halo-tiled spatial grid: grid = (B, 2).
    out = complex_conv2d(x, w_re, b_re, w_im, b_im,
                         stride=stride, padding=padding, dilation=dilation,
                         tile_h=8)
    out = jax.block_until_ready(out)

    ref = _reference(x, w_re, b_re, w_im, b_im, stride, padding, dilation)
    assert out.shape == (B, Cout, H, W, 2), out.shape
    max_err = float(jnp.max(jnp.abs(out - ref)))
    assert jnp.allclose(out, ref, atol=1e-4, rtol=1e-4), \
        f"mismatch vs reference, max abs err = {max_err}"

    print("KERNEL_OK")
</pallas_src>

<mosaic_0001>
module attributes {stable_mosaic.version = 11 : i64} {
  func.func @kernel(%arg0: i32, %arg1: i32, %arg2: memref<1x1x10x18x128xf32, #tpu.memory_space<vmem>>, %arg3: memref<1152x128xf32, #tpu.memory_space<vmem>>, %arg4: memref<1x128xf32, #tpu.memory_space<vmem>>, %arg5: memref<1x8x16x128xf32, #tpu.memory_space<vmem>>) attributes {dimension_semantics = [#tpu.dimension_semantics<parallel>, #tpu.dimension_semantics<parallel>], iteration_bounds = array<i64: 2, 2>, scalar_prefetch = 0 : i64, scratch_operands = 0 : i64, tpu.core_type = #tpu.core_type<tc>, window_params = [{transform_indices = @transform_0, window_bounds = array<i64: 1, 1, 10, 18, 128>}, {pipeline_mode = #tpu.pipeline_mode<synchronous>, transform_indices = @transform_1, window_bounds = array<i64: 1152, 128>}, {pipeline_mode = #tpu.pipeline_mode<synchronous>, transform_indices = @transform_2, window_bounds = array<i64: 1, 128>}, {transform_indices = @transform_3, window_bounds = array<i64: 1, 8, 16, 128>}]} {
    %c0 = arith.constant 0 : index
    %c0_0 = arith.constant 0 : index
    %c0_1 = arith.constant 0 : index
    %c0_2 = arith.constant 0 : index
    %c0_3 = arith.constant 0 : index
    %0 = vector.load %arg2[%c0, %c0_0, %c0_1, %c0_2, %c0_3] : memref<1x1x10x18x128xf32, #tpu.memory_space<vmem>>, vector<1x1x8x16x128xf32>
    %1 = vector.shape_cast %0 : vector<1x1x8x16x128xf32> to vector<8x16x128xf32>
    %c0_4 = arith.constant 0 : index
    %c0_5 = arith.constant 0 : index
    %c0_6 = arith.constant 0 : index
    %c1 = arith.constant 1 : index
    %c0_7 = arith.constant 0 : index
    %2 = vector.load %arg2[%c0_4, %c0_5, %c0_6, %c1, %c0_7] : memref<1x1x10x18x128xf32, #tpu.memory_space<vmem>>, vector<1x1x8x16x128xf32>
    %3 = vector.shape_cast %2 : vector<1x1x8x16x128xf32> to vector<8x16x128xf32>
    %c0_8 = arith.constant 0 : index
    %c0_9 = arith.constant 0 : index
    %c0_10 = arith.constant 0 : index
    %c2 = arith.constant 2 : index
    %c0_11 = arith.constant 0 : index
    %4 = vector.load %arg2[%c0_8, %c0_9, %c0_10, %c2, %c0_11] : memref<1x1x10x18x128xf32, #tpu.memory_space<vmem>>, vector<1x1x8x16x128xf32>
    %5 = vector.shape_cast %4 : vector<1x1x8x16x128xf32> to vector<8x16x128xf32>
    %c0_12 = arith.constant 0 : index
    %c0_13 = arith.constant 0 : index
    %c1_14 = arith.constant 1 : index
    %c0_15 = arith.constant 0 : index
    %c0_16 = arith.constant 0 : index
    %6 = vector.load %arg2[%c0_12, %c0_13, %c1_14, %c0_15, %c0_16] : memref<1x1x10x18x128xf32, #tpu.memory_space<vmem>>, vector<1x1x8x16x128xf32>
    %7 = vector.shape_cast %6 : vector<1x1x8x16x128xf32> to vector<8x16x128xf32>
    %c0_17 = arith.constant 0 : index
    %c0_18 = arith.constant 0 : index
    %c1_19 = arith.constant 1 : index
    %c1_20 = arith.constant 1 : index
    %c0_21 = arith.constant 0 : index
    %8 = vector.load %arg2[%c0_17, %c0_18, %c1_19, %c1_20, %c0_21] : memref<1x1x10x18x128xf32, #tpu.memory_space<vmem>>, vector<1x1x8x16x128xf32>
    %9 = vector.shape_cast %8 : vector<1x1x8x16x128xf32> to vector<8x16x128xf32>
    %c0_22 = arith.constant 0 : index
    %c0_23 = arith.constant 0 : index
    %c1_24 = arith.constant 1 : index
    %c2_25 = arith.constant 2 : index
    %c0_26 = arith.constant 0 : index
    %10 = vector.load %arg2[%c0_22, %c0_23, %c1_24, %c2_25, %c0_26] : memref<1x1x10x18x128xf32, #tpu.memory_space<vmem>>, vector<1x1x8x16x128xf32>
    %11 = vector.shape_cast %10 : vector<1x1x8x16x128xf32> to vector<8x16x128xf32>
    %c0_27 = arith.constant 0 : index
    %c0_28 = arith.constant 0 : index
    %c2_29 = arith.constant 2 : index
    %c0_30 = arith.constant 0 : index
    %c0_31 = arith.constant 0 : index
    %12 = vector.load %arg2[%c0_27, %c0_28, %c2_29, %c0_30, %c0_31] : memref<1x1x10x18x128xf32, #tpu.memory_space<vmem>>, vector<1x1x8x16x128xf32>
    %13 = vector.shape_cast %12 : vector<1x1x8x16x128xf32> to vector<8x16x128xf32>
    %c0_32 = arith.constant 0 : index
    %c0_33 = arith.constant 0 : index
    %c2_34 = arith.constant 2 : index
    %c1_35 = arith.constant 1 : index
    %c0_36 = arith.constant 0 : index
    %14 = vector.load %arg2[%c0_32, %c0_33, %c2_34, %c1_35, %c0_36] : memref<1x1x10x18x128xf32, #tpu.memory_space<vmem>>, vector<1x1x8x16x128xf32>
    %15 = vector.shape_cast %14 : vector<1x1x8x16x128xf32> to vector<8x16x128xf32>
    %c0_37 = arith.constant 0 : index
    %c0_38 = arith.constant 0 : index
    %c2_39 = arith.constant 2 : index
    %c2_40 = arith.constant 2 : index
    %c0_41 = arith.constant 0 : index
    %16 = vector.load %arg2[%c0_37, %c0_38, %c2_39, %c2_40, %c0_41] : memref<1x1x10x18x128xf32, #tpu.memory_space<vmem>>, vector<1x1x8x16x128xf32>
    %17 = vector.shape_cast %16 : vector<1x1x8x16x128xf32> to vector<8x16x128xf32>
    %18 = tpu.concatenate %1, %3, %5, %7, %9, %11, %13, %15, %17 in 2 : vector<8x16x128xf32>, vector<8x16x128xf32>, vector<8x16x128xf32>, vector<8x16x128xf32>, vector<8x16x128xf32>, vector<8x16x128xf32>, vector<8x16x128xf32>, vector<8x16x128xf32>, vector<8x16x128xf32> -> vector<8x16x1152xf32>
    %19 = vector.shape_cast %18 : vector<8x16x1152xf32> to vector<128x1152xf32>
    %c0_42 = arith.constant 0 : index
    %c0_43 = arith.constant 0 : index
    %20 = vector.load %arg3[%c0_42, %c0_43] : memref<1152x128xf32, #tpu.memory_space<vmem>>, vector<1152x128xf32>
    %cst = arith.constant dense<0.000000e+00> : vector<128x128xf32>
    %21 = tpu.matmul %19, %20, %cst {dimension_numbers = #tpu.dot_dimension_numbers<[1], [0], [0], [1], [0, 0, 1, 1], [], []>} : vector<128x1152xf32>, vector<1152x128xf32>, vector<128x128xf32> -> vector<128x128xf32>
    %c0_44 = arith.constant 0 : index
    %c0_45 = arith.constant 0 : index
    %22 = vector.load %arg4[%c0_44, %c0_45] : memref<1x128xf32, #tpu.memory_space<vmem>>, vector<1x128xf32>
    %23 = vector.broadcast %22 : vector<1x128xf32> to vector<128x128xf32>
    %24 = arith.addf %21, %23 : vector<128x128xf32>
    %25 = vector.shape_cast %24 : vector<128x128xf32> to vector<8x16x128xf32>
    %c0_46 = arith.constant 0 : index
    %c0_47 = arith.constant 0 : index
    %c0_48 = arith.constant 0 : index
    %c0_49 = arith.constant 0 : index
    %26 = vector.load %arg5[%c0_46, %c0_47, %c0_48, %c0_49] : memref<1x8x16x128xf32, #tpu.memory_space<vmem>>, vector<1x8x16x128xf32>
    %27 = vector.shape_cast %26 : vector<1x8x16x128xf32> to vector<8x16x128xf32>
    %28 = vector.shape_cast %25 : vector<8x16x128xf32> to vector<1x8x16x128xf32>
    tpu.vector_store %arg5[%c0_46, %c0_47, %c0_48, %c0_49], %28 {strides = array<i32>} : memref<1x8x16x128xf32, #tpu.memory_space<vmem>>, vector<1x8x16x128xf32>,
    return
  }
  func.func @transform_0(%arg0: i32, %arg1: i32) -> (i32, i32, i32, i32, i32) {
    %c0_i32 = arith.constant 0 : i32
    %c0_i32_0 = arith.constant 0 : i32
    %c0_i32_1 = arith.constant 0 : i32
    %c0_i32_2 = arith.constant 0 : i32
    return %arg0, %arg1, %c0_i32, %c0_i32_0, %c0_i32_1 : i32, i32, i32, i32, i32
  }
  func.func @transform_1(%arg0: i32, %arg1: i32) -> (i32, i32) {
    %c0_i32 = arith.constant 0 : i32
    %c0_i32_0 = arith.constant 0 : i32
    %c0_i32_1 = arith.constant 0 : i32
    return %c0_i32, %c0_i32_0 : i32, i32
  }
  func.func @transform_2(%arg0: i32, %arg1: i32) -> (i32, i32) {
    %c0_i32 = arith.constant 0 : i32
    %c0_i32_0 = arith.constant 0 : i32
    %c0_i32_1 = arith.constant 0 : i32
    return %c0_i32, %c0_i32_0 : i32, i32
  }
  func.func @transform_3(%arg0: i32, %arg1: i32) -> (i32, i32, i32, i32) {
    %c0_i32 = arith.constant 0 : i32
    %c0_i32_0 = arith.constant 0 : i32
    %c0_i32_1 = arith.constant 0 : i32
    return %arg0, %arg1, %c0_i32, %c0_i32_0 : i32, i32, i32, i32
  }
}

</mosaic_0001>

<bundles_post_ra>
// kernel: tpu_custom_call.1
= control target key start
LH: loop header
LB: loop body
LE: loop exit
PB: predicated region body
PF: predicated region fallthrough
CT: control target
= control target key end

     0   :  { %8 = vsyncpa [#allocation3], 0  ;;  %s3212_s0 = inlined_call_operand.vmem [shape: f32[2,2,10,18,128], index: 0, kind: input, shape index: {}]   ;;  %s3213_s1 = inlined_call_operand.vmem [shape: f32[1152,128], index: 1, kind: input, shape index: {}]   ;;  %s3214_s2 = inlined_call_operand.vmem [shape: f32[1,128], index: 2, kind: input, shape index: {}]   ;;  %s3215_s3 = inlined_call_operand.hbm [shape: f32[2,16,16,128], index: 3, kind: output, shape index: {}]  }
   0x1   :  { %10 = vsyncpa [#allocation3 + $0x1], 0  ;;  %s2228_s12 = smov 0   ;;  %s2230_s13 = smov 0  }
   0x2   :  { %s2232_s14 = smov 0   ;;  %s2234_s15 = smov 0  }
   0x3   :  { %s2236_s16 = smov 0   ;;  %s2238_s17 = smov 0  }
   0x4   :  { %s2240_s18 = smov 0   ;;  %s2242_s19 = smov 0  }
   0x5 LB: > { %s1338_s20 = sadd.s32 4294967295, %s2203_s19   ;;  %s1339_s21 = sadd.s32 4294967294, %s2203_s19   ;;  %s2203_s19 = sphi %s2242_s19, %s16_s19   ;;  %s2199_s18 = sphi %s2240_s18, %s3224_s18   ;;  %s2195_s17 = sphi %s2238_s17, %s3223_s17   ;;  %s2191_s16 = sphi %s2236_s16, %s3222_s16   ;;  %s2187_s15 = sphi %s2234_s15, %s3221_s15   ;;  %s2183_s14 = sphi %s2232_s14, %s3220_s14   ;;  %s2179_s13 = sphi %s2230_s13, %s3219_s13   ;;  %s2175_s12 = sphi %s2228_s12, %s3218_s12  }
   0x6   : > { %s25_s22 = sadd.s32 1, %s2195_s17  ;;  %s28_s23 = sadd.s32 1, %s2199_s18 }
   0x7   : > { %p26_p0 = scmp.ge.s32.totalorder %s25_s22, 2  ;;  %p117_p1 = scmp.ne.s32.totalorder %s2183_s14, %s2179_s13 }
   0x8   : > { %p118_p2 = scmp.eq.s32.totalorder %s1338_s20, 3  ;;  %p123_p5 = scmp.ne.s32.totalorder %s2179_s13, %s2175_s12 }
   0x9   : > { %s3226_s22 = smov (%p26_p0, %s25_s22), 0  ;;  %s3228_s23 = smov (!%p26_p0, %s28_s23), %s2199_s18 }
   0xa   : > { %s103_s24 = ssub.s32 %s2195_s17, %s3226_s22  ;;  %p2279_p3 = por %p118_p2, %p117_p1 }
   0xb   : > { %p30_p4 = scmp.ge.s32.totalorder %s3228_s23, 2  ;;  %p124_p6 = scmp.eq.s32.totalorder %s1339_s21, 3 }
   0xc   : > { %p1342_p7 = scmp.ge.s32.totalorder %s2203_s19, 1  ;;  %p160_p9 = scmp.lt.s32.totalorder %s2203_s19, 5 }
   0xd   : > { %s3230_s23 = smov (%p30_p4, %s3228_s23), 0  ;;  %p2288_p8 = por %p124_p6, %p123_p5 }
   0xe   : > { %s102_s27 = ssub.s32 %s2199_s18, %s3230_s23  ;;  %s107_s28 = sadd.s32 1, %s2183_s14 }
   0xf   : > { %s104_s29 = sor.u32 %s103_s24, %s102_s27  ;;  %p161_p10 = pnand %p1342_p7, %p160_p9 }
  0x10   : > { %p105_p11 = scmp.eq.s32.totalorder %s104_s29, 0  ;;  %v360_v0 = vld [vmem:[%s3213_s1 + $0x80] sm:$0xff] (!%p161_p10)  ;;  %v361_v1 = vld [vmem:[%s3213_s1 + $0x88] sm:$0xff] (!%p161_p10)  ;;  %p188_p12 = scmp.lt.s32.totalorder (!%p161_p10), %s2191_s16, 1  ;;  %v362_v11 = vld [vmem:[%s3213_s1 + $0x90] sm:$0xff] (!%p161_p10) }
  0x11   : > { %164 = sbr.rel (%p161_p10) target bundleno = 424 (0x1a8), region = 32  ;;  %v392_v2 = vld [vmem:[%s3213_s1 + $0x180] sm:$0xff] (!%p161_p10)  ;;  %p190_p13 = scmp.lt.s32.totalorder (!%p161_p10), %s2187_s15, 1  ;;  %v1858_v3 = vpack.c.bf16 (!%p161_p10), %v361_v1, %v360_v0  ;;  %v393_v4 = vld [vmem:[%s3213_s1 + $0x188] sm:$0xff] (!%p161_p10)  ;;  %v363_v13 = vld [vmem:[%s3213_s1 + $0x98] sm:$0xff] (!%p161_p10) }
  0x12   : > { %s2297_s30 = scalar_select %p105_p11, %s2183_s14, %s107_s28  }
  0x13   : > { %v344_v5 = vld [vmem:[%s3213_s1] sm:$0xff] (!%p161_p10)  ;;  %v345_v6 = vld [vmem:[%s3213_s1 + $0x8] sm:$0xff] (!%p161_p10)  ;;  %v1890_v7 = vpack.c.bf16 (!%p161_p10), %v393_v4, %v392_v2  ;;  %1859 = vmatprep.subr.bf16.mxu0 (!%p161_p10), %v1858_v3  ;;  %v394_v14 = vld [vmem:[%s3213_s1 + $0x190] sm:$0xff] (!%p161_p10)  ;;  %v1862_v16 = vpack.c.bf16 (!%p161_p10), %v363_v13, %v362_v11  ;;  %s1449_s4 = sshll.u32 (!%p161_p10), %s2187_s15, 4  ;;  %s1445_s5 = sshll.u32 (!%p161_p10), %s2191_s16, 5 }
  0x14   : > { %v1860_v8 = vpack.c.bf16 (!%p161_p10), %v345_v6, %v344_v5  ;;  %v376_v9 = vld [vmem:[%s3213_s1 + $0x100] sm:$0xff] (!%p161_p10)  ;;  %v377_v10 = vld [vmem:[%s3213_s1 + $0x108] sm:$0xff] (!%p161_p10)  ;;  %v395_v15 = vld [vmem:[%s3213_s1 + $0x198] sm:$0xff] (!%p161_p10)  ;;  %s1250_s8 = sadd.s32 (!%p161_p10), %s1449_s4, %s1445_s5  ;;  %s2205_s20 = smov (!%p161_p10), [#allocation2]  }
  0x15   : > { %v1892_v12 = vpack.c.bf16 (!%p161_p10), %v377_v10, %v376_v9  ;;  %1891 = vmatprep.subr.bf16.mxu1 (!%p161_p10), %v1890_v7  ;;  %v1894_v17 = vpack.c.bf16 (!%p161_p10), %v395_v15, %v394_v14  ;;  %v346_v18 = vld [vmem:[%s3213_s1 + $0x10] sm:$0xff] (!%p161_p10)  ;;  %v347_v19 = vld [vmem:[%s3213_s1 + $0x18] sm:$0xff] (!%p161_p10)  ;;  %v364_v23 = vld [vmem:[%s3213_s1 + $0xa0] sm:$0xff] (!%p161_p10)  ;;  %s2113_s21 = sshll.u32 (!%p161_p10), %s2205_s20, 4  ;;  %s2114_s21 = int_to_ptr.vmem [resolvable:$false] %s2113_s21 }
  0x16   : > { %1861 = vmatpush3.bf16.msra.mxu0 (!%p161_p10), %v1860_v8  ;;  %v378_v20 = vld [vmem:[%s3213_s1 + $0x110] sm:$0xff] (!%p161_p10)  ;;  %v1864_v21 = vpack.c.bf16 (!%p161_p10), %v347_v19, %v346_v18  ;;  %v379_v22 = vld [vmem:[%s3213_s1 + $0x118] sm:$0xff] (!%p161_p10)  ;;  %v365_v24 = vld [vmem:[%s3213_s1 + $0xa8] sm:$0xff] (!%p161_p10)  ;;  %s2115_s28 = scalar_lea.vmem (!%p161_p10), %s2114_s21, 4096 }
  0x17   : > { %1893 = vmatpush3.bf16.msra.mxu1 (!%p161_p10), %v1892_v12  ;;  %1863 = vmatprep.subr.bf16.mxu0 (!%p161_p10), %v1862_v16  ;;  %v1896_v25 = vpack.c.bf16 (!%p161_p10), %v379_v22, %v378_v20  ;;  %v1866_v26 = vpack.c.bf16 (!%p161_p10), %v365_v24, %v364_v23  ;;  %v396_v27 = vld [vmem:[%s3213_s1 + $0x1a0] sm:$0xff] (!%p161_p10)  ;;  %v397_v28 = vld [vmem:[%s3213_s1 + $0x1a8] sm:$0xff] (!%p161_p10)  ;;  %v366_v35 = vld [vmem:[%s3213_s1 + $0xb0] sm:$0xff] (!%p161_p10) }
  0x18   : > { %s2340_s24 = scalar_select %p188_p12, %s2191_s16, 1  ;;  %1895 = vmatprep.subr.bf16.mxu1 %v1894_v17  ;;  %v348_v29 = vld [vmem:[%s3213_s1 + $0x20] sm:$0xff]  ;;  %v1898_v30 = vpack.c.bf16 %v397_v28, %v396_v27  ;;  %v349_v31 = vld [vmem:[%s3213_s1 + $0x28] sm:$0xff]  ;;  %v367_v36 = vld [vmem:[%s3213_s1 + $0xb8] sm:$0xff] }
  0x19   : > { %s2354_s7 = scalar_select %p190_p13, %s2187_s15, 1  ;;  %v380_v32 = vld [vmem:[%s3213_s1 + $0x120] sm:$0xff]  ;;  %v381_v33 = vld [vmem:[%s3213_s1 + $0x128] sm:$0xff]  ;;  %v1868_v34 = vpack.c.bf16 %v349_v31, %v348_v29  ;;  %v398_v37 = vld [vmem:[%s3213_s1 + $0x1b0] sm:$0xff]  ;;  %v1870_v39 = vpack.c.bf16 %v367_v36, %v366_v35 }
  0x1a   : > { %s2035_s27 = smul.u32 60, %s2340_s24  ;;  %1865 = vmatpush3.bf16.msra.mxu0 %v1864_v21  ;;  %v1900_v38 = vpack.c.bf16 %v381_v33, %v380_v32  ;;  %v399_v40 = vld [vmem:[%s3213_s1 + $0x1b8] sm:$0xff]  ;;  %v350_v41 = vld [vmem:[%s3213_s1 + $0x30] sm:$0xff]  ;;  %v368_v46 = vld [vmem:[%s3213_s1 + $0xc0] sm:$0xff]  ;;  %s1446_s15 = sshll.u32 %s1250_s8, 7 }
  0x1b   : > { %s2034_s9 = smul.u32 30, %s2354_s7  ;;  %1897 = vmatpush3.bf16.msra.mxu1 %v1896_v25  ;;  %1867 = vmatprep.subr.bf16.mxu0 %v1866_v26  ;;  %v351_v42 = vld [vmem:[%s3213_s1 + $0x38] sm:$0xff]  ;;  %v1902_v43 = vpack.c.bf16 %v399_v40, %v398_v37  ;;  %v382_v44 = vld [vmem:[%s3213_s1 + $0x130] sm:$0xff]  ;;  %v369_v47 = vld [vmem:[%s3213_s1 + $0xc8] sm:$0xff]  ;;  %s3150_s10 = scalar_lea.hbm %s3215_s3, %s1446_s15 }
  0x1c   : > { %1899 = vmatprep.subr.bf16.mxu1 %v1898_v30  ;;  %v383_v45 = vld [vmem:[%s3213_s1 + $0x138] sm:$0xff]  ;;  %v400_v48 = vld [vmem:[%s3213_s1 + $0x1c0] sm:$0xff]  ;;  %v401_v49 = vld [vmem:[%s3213_s1 + $0x1c8] sm:$0xff]  ;;  %v1872_v50 = vpack.c.bf16 %v351_v42, %v350_v41  ;;  %v1874_v52 = vpack.c.bf16 %v369_v47, %v368_v46 }
  0x1d   : > { %s2421_s29 = sadd.s32 %s2035_s27, %s2034_s9  ;;  %v1904_v51 = vpack.c.bf16 %v383_v45, %v382_v44  ;;  %v352_v53 = vld [vmem:[%s3213_s1 + $0x40] sm:$0xff]  ;;  %v353_v54 = vld [vmem:[%s3213_s1 + $0x48] sm:$0xff]  ;;  %v1906_v56 = vpack.c.bf16 %v401_v49, %v400_v48  ;;  %v370_v58 = vld [vmem:[%s3213_s1 + $0xd0] sm:$0xff] }
  0x1e   : > { %1869 = vmatpush3.bf16.msra.mxu0 %v1868_v34  ;;  %v384_v55 = vld [vmem:[%s3213_s1 + $0x140] sm:$0xff]  ;;  %v385_v57 = vld [vmem:[%s3213_s1 + $0x148] sm:$0xff]  ;;  %v371_v59 = vld [vmem:[%s3213_s1 + $0xd8] sm:$0xff]  ;;  %s1344_s6 = sshll.u32 %s2421_s29, 3  ;;  %v1876_v62 = vpack.c.bf16 %v353_v54, %v352_v53 }
  0x1f   : > { %1901 = vmatpush3.bf16.msra.mxu1 %v1900_v38  ;;  %1871 = vmatprep.subr.bf16.mxu0 %v1870_v39  ;;  %v402_v60 = vld [vmem:[%s3213_s1 + $0x1d0] sm:$0xff]  ;;  %v403_v61 = vld [vmem:[%s3213_s1 + $0x1d8] sm:$0xff]  ;;  %v1908_v63 = vpack.c.bf16 %v385_v57, %v384_v55  ;;  %v1878_v0 = vpack.c.bf16 %v371_v59, %v370_v58  ;;  %v372_v6 = vld [vmem:[%s3213_s1 + $0xe0] sm:$0xff]  ;;  %s2469_s24 = scalar_lea.vmem %s3212_s0, %s1344_s6 }
  0x20   : > { %1903 = vmatprep.subr.bf16.mxu1 %v1902_v43  ;;  %v354_v1 = vld [vmem:[%s3213_s1 + $0x50] sm:$0xff]  ;;  %v355_v2 = vld [vmem:[%s3213_s1 + $0x58] sm:$0xff]  ;;  %v1910_v4 = vpack.c.bf16 %v403_v61, %v402_v60  ;;  %v373_v7 = vld [vmem:[%s3213_s1 + $0xe8] sm:$0xff] }
  0x21   : > { %v386_v3 = vld [vmem:[%s3213_s1 + $0x150] sm:$0xff]  ;;  %v387_v5 = vld [vmem:[%s3213_s1 + $0x158] sm:$0xff]  ;;  %v404_v8 = vld [vmem:[%s3213_s1 + $0x1e0] sm:$0xff]  ;;  %v1880_v10 = vpack.c.bf16 %v355_v2, %v354_v1  ;;  %v1882_v14 = vpack.c.bf16 %v373_v7, %v372_v6 }
  0x22   : > { %1873 = vmatpush3.bf16.msra.mxu0 %v1872_v50  ;;  %v405_v9 = vld [vmem:[%s3213_s1 + $0x1e8] sm:$0xff]  ;;  %v356_v11 = vld [vmem:[%s3213_s1 + $0x60] sm:$0xff]  ;;  %v1912_v13 = vpack.c.bf16 %v387_v5, %v386_v3  ;;  %v2488_v17 = vld [vmem:[%s2469_s24 + $0x18] sm:$0xff] }
  0x23   : > { %1905 = vmatpush3.bf16.msra.mxu1 %v1904_v51  ;;  %1875 = vmatprep.subr.bf16.mxu0 %v1874_v52  ;;  %v357_v12 = vld [vmem:[%s3213_s1 + $0x68] sm:$0xff]  ;;  %v388_v15 = vld [vmem:[%s3213_s1 + $0x160] sm:$0xff]  ;;  %v1914_v18 = vpack.c.bf16 %v405_v9, %v404_v8  ;;  %v374_v20 = vld [vmem:[%s3213_s1 + $0xf0] sm:$0xff] }
  0x24   : > { %1907 = vmatprep.subr.bf16.mxu1 %v1906_v56  ;;  %v214_v16 = vld [vmem:[%s2469_s24 + $0x1] sm:$0xff]  ;;  %v375_v21 = vld [vmem:[%s3213_s1 + $0xf8] sm:$0xff]  ;;  %v406_v22 = vld [vmem:[%s3213_s1 + $0x1f0] sm:$0xff]  ;;  %704 = vmatprep.mubr.f32.mxu1 %v2488_v17  ;;  %v1884_v24 = vpack.c.bf16 %v357_v12, %v356_v11 }
  0x25   : > { %v389_v19 = vld [vmem:[%s3213_s1 + $0x168] sm:$0xff]  ;;  %559 = vmatprep.mubr.f32.mxu0 %v214_v16  ;;  %v407_v23 = vld [vmem:[%s3213_s1 + $0x1f8] sm:$0xff]  ;;  %v1886_v26 = vpack.c.bf16 %v375_v21, %v374_v20  ;;  %v358_v27 = vld [vmem:[%s3213_s1 + $0x70] sm:$0xff] }
  0x26   : > { %1877 = vmatpush3.bf16.msra.mxu0 %v1876_v62  ;;  %v1916_v25 = vpack.c.bf16 %v389_v19, %v388_v15  ;;  %v359_v28 = vld [vmem:[%s3213_s1 + $0x78] sm:$0xff]  ;;  %v390_v29 = vld [vmem:[%s3213_s1 + $0x170] sm:$0xff]  ;;  %v1918_v30 = vpack.c.bf16 %v407_v23, %v406_v22  ;;  %v424_v32 = vld [vmem:[%s3213_s1 + $0x280] sm:$0xff] }
  0x27   : > { %1909 = vmatpush3.bf16.msra.mxu1 %v1908_v63  ;;  %1879 = vmatprep.subr.bf16.mxu0 %v1878_v0  ;;  %v391_v31 = vld [vmem:[%s3213_s1 + $0x178] sm:$0xff]  ;;  %v425_v33 = vld [vmem:[%s3213_s1 + $0x288] sm:$0xff]  ;;  %v456_v34 = vld [vmem:[%s3213_s1 + $0x380] sm:$0xff]  ;;  %v1888_v36 = vpack.c.bf16 %v359_v28, %v358_v27 }
  0x28   : > { %1911 = vmatprep.subr.bf16.mxu1 %v1910_v4  ;;  %v457_v35 = vld [vmem:[%s3213_s1 + $0x388] sm:$0xff]  ;;  %v1920_v37 = vpack.c.bf16 %v391_v31, %v390_v29  ;;  %v1922_v38 = vpack.c.bf16 %v425_v33, %v424_v32  ;;  %v408_v39 = vld [vmem:[%s3213_s1 + $0x200] sm:$0xff]  ;;  %v426_v44 = vld [vmem:[%s3213_s1 + $0x290] sm:$0xff] }
  0x29   : > { %v409_v40 = vld [vmem:[%s3213_s1 + $0x208] sm:$0xff]  ;;  %v1954_v41 = vpack.c.bf16 %v457_v35, %v456_v34  ;;  %v440_v42 = vld [vmem:[%s3213_s1 + $0x300] sm:$0xff]  ;;  %v427_v45 = vld [vmem:[%s3213_s1 + $0x298] sm:$0xff] }
  0x2a   : > { %1881 = vmatpush3.bf16.msra.mxu0 %v1880_v10  ;;  %v441_v43 = vld [vmem:[%s3213_s1 + $0x308] sm:$0xff]  ;;  %v198_v46 = vld [vmem:[%s2469_s24] sm:$0xff]  ;;  %v1924_v47 = vpack.c.bf16 %v409_v40, %v408_v39  ;;  %v458_v48 = vld [vmem:[%s3213_s1 + $0x390] sm:$0xff]  ;;  %v1926_v54 = vpack.c.bf16 %v427_v45, %v426_v44 }
  0x2b   : > { %1913 = vmatpush3.bf16.msra.mxu1 %v1912_v13  ;;  %1883 = vmatprep.subr.bf16.mxu0 %v1882_v14  ;;  %v459_v49 = vld [vmem:[%s3213_s1 + $0x398] sm:$0xff]  ;;  %v230_v50 = vld [vmem:[%s2469_s24 + $0x2] sm:$0xff]  ;;  %v1956_v51 = vpack.c.bf16 %v441_v43, %v440_v42  ;;  %v410_v55 = vld [vmem:[%s3213_s1 + $0x210] sm:$0xff] }
  0x2c   : > { %1915 = vmatprep.subr.bf16.mxu1 %v1914_v18  ;;  %v215_v52 = vld [vmem:[%s2469_s24 + $0x9] sm:$0xff]  ;;  %v2558_v53 = vld [vmem:[%s2469_s24 + $0x20] sm:$0xff]  ;;  %v411_v56 = vld [vmem:[%s3213_s1 + $0x218] sm:$0xff]  ;;  %v1958_v58 = vpack.c.bf16 %v459_v49, %v458_v48 }
  0x2d   : > { %v442_v57 = vld [vmem:[%s3213_s1 + $0x310] sm:$0xff]  ;;  %v443_v59 = vld [vmem:[%s3213_s1 + $0x318] sm:$0xff]  ;;  %v428_v60 = vld [vmem:[%s3213_s1 + $0x2a0] sm:$0xff]  ;;  %v1928_v4 = vpack.c.bf16 %v411_v56, %v410_v55 }
  0x2e   : > { %1885 = vmatpush3.bf16.msra.mxu0 %v1884_v24  ;;  %v429_v61 = vld [vmem:[%s3213_s1 + $0x2a8] sm:$0xff]  ;;  %v460_v63 = vld [vmem:[%s3213_s1 + $0x3a0] sm:$0xff]  ;;  %v2590_v3 = vld [vmem:[%s2469_s24 + $0x30] sm:$0xff]  ;;  %v1960_v5 = vpack.c.bf16 %v443_v59, %v442_v57 }
  0x2f   : > { %1917 = vmatpush3.bf16.msra.mxu1 %v1916_v25  ;;  %1887 = vmatprep.subr.bf16.mxu0 %v1886_v26  ;;  %v199_v62 = vld [vmem:[%s2469_s24 + $0x8] sm:$0xff]  ;;  %v2587_v2 = vld [vmem:[%s2469_s24 + $0x19] sm:$0xff]  ;;  %v1930_v6 = vpack.c.bf16 %v429_v61, %v428_v60  ;;  %v430_v12 = vld [vmem:[%s3213_s1 + $0x2b0] sm:$0xff] }
  0x30   : > { %1919 = vmatprep.subr.bf16.mxu1 %v1918_v30  ;;  %v461_v0 = vld [vmem:[%s3213_s1 + $0x3a8] sm:$0xff]  ;;  %v412_v7 = vld [vmem:[%s3213_s1 + $0x220] sm:$0xff]  ;;  %v431_v13 = vld [vmem:[%s3213_s1 + $0x2b8] sm:$0xff] }
  0x31   : > { %v231_v1 = vld [vmem:[%s2469_s24 + $0xa] sm:$0xff]  ;;  %v444_v9 = vld [vmem:[%s3213_s1 + $0x320] sm:$0xff]  ;;  %v1962_v10 = vpack.c.bf16 %v461_v0, %v460_v63  ;;  %v463_v15 = vld [vmem:[%s3213_s1 + $0x3b8] sm:$0xff]  ;;  %v1934_v22 = vpack.c.bf16 %v431_v13, %v430_v12 }
  0x32   : > { %1889 = vmatpush3.bf16.msra.mxu0 %v1888_v36  ;;  %v413_v8 = vld [vmem:[%s3213_s1 + $0x228] sm:$0xff]  ;;  %v462_v14 = vld [vmem:[%s3213_s1 + $0x3b0] sm:$0xff]  ;;  %v2620_v16 = vld [vmem:[%s2469_s24 + $0x1a] sm:$0xff] }
  0x33   : > { %1921 = vmatpush3.bf16.msra.mxu1 %v1920_v37  ;;  %1923 = vmatprep.subr.bf16.mxu0 %v1922_v38  ;;  %v445_v11 = vld [vmem:[%s3213_s1 + $0x328] sm:$0xff]  ;;  %v2626_v19 = vld [vmem:[%s2469_s24 + $0x38] sm:$0xff]  ;;  %v1932_v20 = vpack.c.bf16 %v413_v8, %v412_v7  ;;  %v414_v23 = vld [vmem:[%s3213_s1 + $0x230] sm:$0xff]  ;;  %v1966_v26 = vpack.c.bf16 %v463_v15, %v462_v14 }
  0x34   : > { %1955 = vmatprep.subr.bf16.mxu1 %v1954_v41  ;;  %v2623_v18 = vld [vmem:[%s2469_s24 + $0x21] sm:$0xff]  ;;  %v1964_v21 = vpack.c.bf16 %v445_v11, %v444_v9  ;;  %v415_v24 = vld [vmem:[%s3213_s1 + $0x238] sm:$0xff]  ;;  %v446_v25 = vld [vmem:[%s3213_s1 + $0x330] sm:$0xff] }
  0x35   : > { %560 = vmatmul.mubr.f32.vlgmr.msra.gmra.mrb[0].mxu0 %v198_v46  ;;  %v447_v27 = vld [vmem:[%s3213_s1 + $0x338] sm:$0xff]  ;;  %v432_v28 = vld [vmem:[%s3213_s1 + $0x2c0] sm:$0xff]  ;;  %v433_v29 = vld [vmem:[%s3213_s1 + $0x2c8] sm:$0xff]  ;;  %v1936_v34 = vpack.c.bf16 %v415_v24, %v414_v23 }
  0x36   : > { %705 = vmatmul.mubr.f32.vlgmr.msra.gmra.mrb[0].mxu1 %v230_v50  ;;  %1925 = vmatpush3.bf16.msra.mxu0 %v1924_v47  ;;  %v465_v30 = vld [vmem:[%s3213_s1 + $0x3c8] sm:$0xff]  ;;  %v2660_v32 = vld [vmem:[%s2469_s24 + $0x31] sm:$0xff]  ;;  %v1968_v35 = vpack.c.bf16 %v447_v27, %v446_v25  ;;  %v1938_v36 = vpack.c.bf16 %v433_v29, %v432_v28  ;;  %v416_v37 = vld [vmem:[%s3213_s1 + $0x240] sm:$0xff] }
  0x37   : > { %1957 = vmatpush3.bf16.msra.mxu1 %v1956_v51  ;;  %564 = vmatprep.mubr.f32.mxu0 %v215_v52  ;;  %v2657_v31 = vld [vmem:[%s2469_s24 + $0x22] sm:$0xff]  ;;  %v434_v42 = vld [vmem:[%s3213_s1 + $0x2d0] sm:$0xff]  ;;  %v435_v43 = vld [vmem:[%s3213_s1 + $0x2d8] sm:$0xff] }
  0x38   : > { %709 = vmatprep.mubr.f32.mxu1 %v2558_v53  ;;  %1927 = vmatprep.subr.bf16.mxu0 %v1926_v54  ;;  %v2663_v33 = vld [vmem:[%s2469_s24 + $0x48] sm:$0xff]  ;;  %v448_v39 = vld [vmem:[%s3213_s1 + $0x340] sm:$0xff]  ;;  %v466_v44 = vld [vmem:[%s3213_s1 + $0x3d0] sm:$0xff]  ;;  %v1942_v51 = vpack.c.bf16 %v435_v43, %v434_v42 }
  0x39   : > { %565 = vmatmul.mubr.f32.gmra.mrb[2].mxu0 %v199_v62  ;;  %1959 = vmatprep.subr.bf16.mxu1 %v1958_v58  ;;  %v417_v38 = vld [vmem:[%s3213_s1 + $0x248] sm:$0xff]  ;;  %v467_v45 = vld [vmem:[%s3213_s1 + $0x3d8] sm:$0xff]  ;;  %v2700_v48 = vld [vmem:[%s2469_s24 + $0x50] sm:$0xff] }
  0x3a   : > { %710 = vmatmul.mubr.f32.gmra.mrb[2].mxu1 %v231_v1  ;;  %569 = vmatprep.mubr.f32.mxu0 %v2587_v2  ;;  %v449_v41 = vld [vmem:[%s3213_s1 + $0x348] sm:$0xff]  ;;  %v2694_v46 = vld [vmem:[%s2469_s24 + $0x32] sm:$0xff]  ;;  %v1940_v49 = vpack.c.bf16 %v417_v38, %v416_v37  ;;  %v1974_v55 = vpack.c.bf16 %v467_v45, %v466_v44  ;;  %v436_v57 = vld [vmem:[%s3213_s1 + $0x2e0] sm:$0xff] }
  0x3b   : > { %714 = vmatprep.mubr.f32.mxu1 %v2590_v3  ;;  %1929 = vmatpush3.bf16.msra.mxu0 %v1928_v4  ;;  %v2697_v47 = vld [vmem:[%s2469_s24 + $0x39] sm:$0xff]  ;;  %v1972_v50 = vpack.c.bf16 %v449_v41, %v448_v39  ;;  %v418_v52 = vld [vmem:[%s3213_s1 + $0x250] sm:$0xff]  ;;  %v437_v58 = vld [vmem:[%s3213_s1 + $0x2e8] sm:$0xff] }
  0x3c   : > { %1961 = vmatpush3.bf16.msra.mxu1 %v1960_v5  ;;  %1931 = vmatprep.subr.bf16.mxu0 %v1930_v6  ;;  %v450_v54 = vld [vmem:[%s3213_s1 + $0x350] sm:$0xff]  ;;  %v451_v56 = vld [vmem:[%s3213_s1 + $0x358] sm:$0xff]  ;;  %v468_v59 = vld [vmem:[%s3213_s1 + $0x3e0] sm:$0xff]  ;;  %v1946_v4 = vpack.c.bf16 %v437_v58, %v436_v57 }
  0x3d   : > { %570 = vmatmul.mubr.f32.gmra.mrb[4].mxu0 %v2488_v17  ;;  %1963 = vmatprep.subr.bf16.mxu1 %v1962_v10  ;;  %v464_v17 = vld [vmem:[%s3213_s1 + $0x3c0] sm:$0xff]  ;;  %v469_v60 = vld [vmem:[%s3213_s1 + $0x3e8] sm:$0xff]  ;;  %v1976_v1 = vpack.c.bf16 %v451_v56, %v450_v54  ;;  %v438_v10 = vld [vmem:[%s3213_s1 + $0x2f0] sm:$0xff] }
  0x3e   : > { %715 = vmatmul.mubr.f32.gmra.mrb[4].mxu1 %v2620_v16  ;;  %574 = vmatprep.mubr.f32.mxu0 %v2623_v18  ;;  %v1970_v40 = vpack.c.bf16 %v465_v30, %v464_v17  ;;  %v2731_v61 = vld [vmem:[%s2469_s24 + $0x3a] sm:$0xff]  ;;  %v2734_v62 = vld [vmem:[%s2469_s24 + $0x49] sm:$0xff]  ;;  %v1978_v7 = vpack.c.bf16 %v469_v60, %v468_v59  ;;  %v2771_v15 = vld [vmem:[%s2469_s24 + $0x51] sm:$0xff] }
  0x3f   : > { %719 = vmatprep.mubr.f32.mxu1 %v2626_v19  ;;  %1933 = vmatpush3.bf16.msra.mxu0 %v1932_v20  ;;  %v2737_v0 = vld [vmem:[%s2469_s24 + $0x60] sm:$0xff]  ;;  %v421_v6 = vld [vmem:[%s3213_s1 + $0x268] sm:$0xff]  ;;  %v439_v11 = vld [vmem:[%s3213_s1 + $0x2f8] sm:$0xff] }
  0x40   : > { %1965 = vmatpush3.bf16.msra.mxu1 %v1964_v21  ;;  %1935 = vmatprep.subr.bf16.mxu0 %v1934_v22  ;;  %v420_v5 = vld [vmem:[%s3213_s1 + $0x260] sm:$0xff]  ;;  %v453_v9 = vld [vmem:[%s3213_s1 + $0x368] sm:$0xff]  ;;  %v470_v12 = vld [vmem:[%s3213_s1 + $0x3f0] sm:$0xff]  ;;  %v1950_v23 = vpack.c.bf16 %v439_v11, %v438_v10 }
  0x41   : > { %575 = vmatmul.mubr.f32.gmra.mrb[6].mxu0 %v2558_v53  ;;  %1967 = vmatprep.subr.bf16.mxu1 %v1966_v26  ;;  %v419_v53 = vld [vmem:[%s3213_s1 + $0x258] sm:$0xff]  ;;  %v452_v8 = vld [vmem:[%s3213_s1 + $0x360] sm:$0xff]  ;;  %v2768_v14 = vld [vmem:[%s2469_s24 + $0x4a] sm:$0xff]  ;;  %v1948_v21 = vpack.c.bf16 %v421_v6, %v420_v5 }
  0x42   : > { %720 = vmatmul.mubr.f32.gmra.mrb[6].mxu1 %v2657_v31  ;;  %579 = vmatprep.mubr.f32.mxu0 %v2660_v32  ;;  %v1944_v63 = vpack.c.bf16 %v419_v53, %v418_v52  ;;  %v471_v13 = vld [vmem:[%s3213_s1 + $0x3f8] sm:$0xff]  ;;  %v2774_v20 = vld [vmem:[%s2469_s24 + $0x68] sm:$0xff]  ;;  %v1980_v22 = vpack.c.bf16 %v453_v9, %v452_v8  ;;  %v422_v24 = vld [vmem:[%s3213_s1 + $0x270] sm:$0xff] }
  0x43   : > { %724 = vmatprep.mubr.f32.mxu1 %v2663_v33  ;;  %1937 = vmatpush3.bf16.msra.mxu0 %v1936_v34  ;;  %v423_v25 = vld [vmem:[%s3213_s1 + $0x278] sm:$0xff]  ;;  %v454_v26 = vld [vmem:[%s3213_s1 + $0x370] sm:$0xff]  ;;  %v1982_v27 = vpack.c.bf16 %v471_v13, %v470_v12  ;;  %v472_v29 = vld [vmem:[%s3213_s1 + $0x400] sm:$0xff] }
  0x44   : > { %1969 = vmatpush3.bf16.msra.mxu1 %v1968_v35  ;;  %1939 = vmatprep.subr.bf16.mxu0 %v1938_v36  ;;  %v455_v28 = vld [vmem:[%s3213_s1 + $0x378] sm:$0xff]  ;;  %v473_v17 = vld [vmem:[%s3213_s1 + $0x408] sm:$0xff]  ;;  %v1952_v35 = vpack.c.bf16 %v423_v25, %v422_v24  ;;  %v2820_v41 = vld [vmem:[%s2469_s24 + $0x80] sm:$0xff] }
  0x45   : > { %580 = vmatmul.mubr.f32.gmra.mrb[8].mxu0 %v2590_v3  ;;  %1971 = vmatprep.subr.bf16.mxu1 %v1970_v40  ;;  %v2799_v30 = vld [vmem:[%s2469_s24 + $0x52] sm:$0xff]  ;;  %v2802_v34 = vld [vmem:[%s2469_s24 + $0x61] sm:$0xff]  ;;  %v1984_v37 = vpack.c.bf16 %v455_v28, %v454_v26  ;;  %v2807_v38 = vpack.c.bf16 %v473_v17, %v472_v29  ;;  %v2817_v40 = vld [vmem:[%s2469_s24 + $0x69] sm:$0xff] }
  0x46   : > { %725 = vmatmul.mubr.f32.gmra.mrb[8].mxu1 %v2694_v46  ;;  %584 = vmatprep.mubr.f32.mxu0 %v2697_v47  ;;  %v2805_v36 = vld [vmem:[%s2469_s24 + $0x78] sm:$0xff]  ;;  %v2814_v39 = vld [vmem:[%s2469_s24 + $0x62] sm:$0xff]  ;;  %v2829_v42 = vld [vmem:[%s2469_s24 + $0x6a] sm:$0xff] }
  0x47   : > { %729 = vmatprep.mubr.f32.mxu1 %v2700_v48  ;;  %1941 = vmatpush3.bf16.msra.mxu0 %v1940_v49  ;;  %v2832_v43 = vld [vmem:[%s2469_s24 + $0x79] sm:$0xff]  ;;  %v2835_v44 = vld [vmem:[%s2469_s24 + $0x90] sm:$0xff]  ;;  %v2845_v49 = vld [vmem:[%s2469_s24 + $0x81] sm:$0xff] }
  0x48   : > { %1973 = vmatpush3.bf16.msra.mxu1 %v1972_v50  ;;  %1943 = vmatprep.subr.bf16.mxu0 %v1942_v51  ;;  %v2842_v45 = vld [vmem:[%s2469_s24 + $0x7a] sm:$0xff]  ;;  %v2855_v51 = vld [vmem:[%s2469_s24 + $0x82] sm:$0xff]  ;;  %v2858_v52 = vld [vmem:[%s2469_s24 + $0x91] sm:$0xff] }
  0x49   : > { %585 = vmatmul.mubr.f32.gmra.mrb[10].mxu0 %v2626_v19  ;;  %1975 = vmatprep.subr.bf16.mxu1 %v1974_v55  ;;  %v2848_v50 = vld [vmem:[%s2469_s24 + $0x98] sm:$0xff]  ;;  %v2861_v53 = vld [vmem:[%s2469_s24 + $0xa8] sm:$0xff]  ;;  %v2874_v56 = vld [vmem:[%s2469_s24 + $0xb0] sm:$0xff] }
  0x4a   : > { %730 = vmatmul.mubr.f32.gmra.mrb[10].mxu1 %v2731_v61  ;;  %589 = vmatprep.mubr.f32.mxu0 %v2734_v62  ;;  %v2868_v54 = vld [vmem:[%s2469_s24 + $0x92] sm:$0xff]  ;;  %v2881_v57 = vld [vmem:[%s2469_s24 + $0x9a] sm:$0xff]  ;;  %v2884_v58 = vld [vmem:[%s2469_s24 + $0xa9] sm:$0xff] }
  0x4b   : > { %734 = vmatprep.mubr.f32.mxu1 %v2737_v0  ;;  %1945 = vmatpush3.bf16.msra.mxu0 %v1944_v63  ;;  %v2871_v55 = vld [vmem:[%s2469_s24 + $0x99] sm:$0xff]  ;;  %v2894_v60 = vld [vmem:[%s2469_s24 + $0xaa] sm:$0xff]  ;;  %v1424_v25 = vld [vmem:[%s2469_s24 + $0xe1] sm:$0xff] }
  0x4c   : > { %1977 = vmatpush3.bf16.msra.mxu1 %v1976_v1  ;;  %1947 = vmatprep.subr.bf16.mxu0 %v1946_v4  ;;  %v2887_v59 = vld [vmem:[%s2469_s24 + $0xc0] sm:$0xff]  ;;  %v2897_v63 = vld [vmem:[%s2469_s24 + $0xb1] sm:$0xff]  ;;  %v2900_v1 = vld [vmem:[%s2469_s24 + $0xc8] sm:$0xff] }
  0x4d   : > { %590 = vmatmul.mubr.f32.gmra.mrb[12].mxu0 %v2663_v33  ;;  %1979 = vmatprep.subr.bf16.mxu1 %v1978_v7  ;;  %v2907_v4 = vld [vmem:[%s2469_s24 + $0xb2] sm:$0xff]  ;;  %v476_v8 = vld [vmem:[%s3213_s1 + $0x420] sm:$0xff]  ;;  %v477_v9 = vld [vmem:[%s3213_s1 + $0x428] sm:$0xff] }
  0x4e   : > { %735 = vmatmul.mubr.f32.gmra.mrb[12].mxu1 %v2768_v14  ;;  %594 = vmatprep.mubr.f32.mxu0 %v2771_v15  ;;  %v474_v5 = vld [vmem:[%s3213_s1 + $0x410] sm:$0xff]  ;;  %v475_v6 = vld [vmem:[%s3213_s1 + $0x418] sm:$0xff]  ;;  %v481_v10 = vld [vmem:[%s3213_s1 + $0x448] sm:$0xff] }
  0x4f   : > { %739 = vmatprep.mubr.f32.mxu1 %v2774_v20  ;;  %1949 = vmatpush3.bf16.msra.mxu0 %v1948_v21  ;;  %v1990_v7 = vpack.c.bf16 %v475_v6, %v474_v5  ;;  %v483_v11 = vld [vmem:[%s3213_s1 + $0x458] sm:$0xff]  ;;  %v485_v12 = vld [vmem:[%s3213_s1 + $0x468] sm:$0xff]  ;;  %v1408_v26 = vld [vmem:[%s2469_s24 + $0xe0] sm:$0xff] }
  0x50   : > { %1981 = vmatpush3.bf16.msra.mxu1 %v1980_v22  ;;  %1951 = vmatprep.subr.bf16.mxu0 %v1950_v23  ;;  %v487_v13 = vld [vmem:[%s3213_s1 + $0x478] sm:$0xff]  ;;  %v1391_v21 = vld [vmem:[%s2469_s24 + $0xc2] sm:$0xff]  ;;  %v1392_v24 = vld [vmem:[%s2469_s24 + $0xca] sm:$0xff] }
  0x51   : > { %595 = vmatmul.mubr.f32.gmra.mrb[14].mxu0 %v2700_v48  ;;  %1983 = vmatprep.subr.bf16.mxu1 %v1982_v27  ;;  %v1423_v22 = vld [vmem:[%s2469_s24 + $0xd9] sm:$0xff] }
  0x52   : > { %740 = vmatmul.mubr.f32.gmra.mrb[14].mxu1 %v2799_v30  ;;  %599 = vmatprep.mubr.f32.mxu0 %v2802_v34  ;;  %v1407_v23 = vld [vmem:[%s2469_s24 + $0xd8] sm:$0xff]  ;;  %v3034_v28 = vld [vmem:[%s3214_s2] ss:$0 sm:$0xff] }
  0x53   : > { %744 = vmatprep.mubr.f32.mxu1 %v2805_v36  ;;  %1953 = vmatpush3.bf16.msra.mxu0 %v1952_v35  ;;  %v1439_v27 = vld [vmem:[%s2469_s24 + $0xda] sm:$0xff] }
  0x54   : > { %1985 = vmatpush3.bf16.msra.mxu1 %v1984_v37  ;;  %1987 = vmatprep.subr.bf16.mxu0 %v2807_v38 }
  0x55   : > { %600 = vmatmul.mubr.f32.gmra.mrb[16].mxu0 %v2737_v0  ;;  %2018 = vmatprep.subr.bf16.mxu1 %v2807_v38 }
  0x56   : > { %745 = vmatmul.mubr.f32.gmra.mrb[16].mxu1 %v2814_v39  ;;  %604 = vmatprep.mubr.f32.mxu0 %v2817_v40 }
  0x57   : > { %749 = vmatprep.mubr.f32.mxu1 %v2820_v41 }
  0x59   : > { %605 = vmatmul.mubr.f32.gmra.mrb[18].mxu0 %v2774_v20 }
  0x5a   : > { %750 = vmatmul.mubr.f32.gmra.mrb[18].mxu1 %v2829_v42  ;;  %609 = vmatprep.mubr.f32.mxu0 %v2832_v43 }
  0x5b   : > { %754 = vmatprep.mubr.f32.mxu1 %v2835_v44 }
  0x5d   : > { %610 = vmatmul.mubr.f32.gmra.mrb[20].mxu0 %v2805_v36 }
  0x5e   : > { %755 = vmatmul.mubr.f32.gmra.mrb[20].mxu1 %v2842_v45  ;;  %614 = vmatprep.mubr.f32.mxu0 %v2845_v49 }
  0x5f   : > { %759 = vmatprep.mubr.f32.mxu1 %v2848_v50 }
  0x61   : > { %615 = vmatmul.mubr.f32.gmra.mrb[22].mxu0 %v2820_v41 }
  0x62   : > { %760 = vmatmul.mubr.f32.gmra.mrb[22].mxu1 %v2855_v51  ;;  %619 = vmatprep.mubr.f32.mxu0 %v2858_v52 }
  0x63   : > { %764 = vmatprep.mubr.f32.mxu1 %v2861_v53 }
  0x65   : > { %620 = vmatmul.mubr.f32.gmra.mrb[24].mxu0 %v2835_v44 }
  0x66   : > { %765 = vmatmul.mubr.f32.gmra.mrb[24].mxu1 %v2868_v54  ;;  %624 = vmatprep.mubr.f32.mxu0 %v2871_v55 }
  0x67   : > { %769 = vmatprep.mubr.f32.mxu1 %v2874_v56 }
  0x69   : > { %625 = vmatmul.mubr.f32.gmra.mrb[26].mxu0 %v2848_v50 }
  0x6a   : > { %770 = vmatmul.mubr.f32.gmra.mrb[26].mxu1 %v2881_v57  ;;  %629 = vmatprep.mubr.f32.mxu0 %v2884_v58 }
  0x6b   : > { %774 = vmatprep.mubr.f32.mxu1 %v2887_v59 }
  0x6d   : > { %630 = vmatmul.mubr.f32.gmra.mrb[28].mxu0 %v2861_v53 }
  0x6e   : > { %775 = vmatmul.mubr.f32.gmra.mrb[28].mxu1 %v2894_v60  ;;  %634 = vmatprep.mubr.f32.mxu0 %v2897_v63 }
  0x6f   : > { %779 = vmatprep.mubr.f32.mxu1 %v2900_v1 }
  0x71   : > { %635 = vmatmul.mubr.f32.gmra.mrb[30].mxu0 %v2874_v56 }
  0x72   : > { %780 = vmatmul.mubr.f32.gmra.mrb[30].mxu1 %v2907_v4  ;;  %849 = vmatprep.mubr.f32.mxu0 %v2620_v16  ;;  %v478_v16 = vld [vmem:[%s3213_s1 + $0x430] sm:$0xff] }
  0x73   : > { %994 = vmatprep.mubr.f32.mxu1 %v2660_v32 }
  0x75   : > { %850 = vmatmul.mubr.f32.vlgmr.msra.gmra.mrb[32].mxu0 %v2587_v2  ;;  %v1994_v2 = vpack.c.bf16 %v477_v9, %v476_v8 }
  0x76   : > { %995 = vmatmul.mubr.f32.vlgmr.msra.gmra.mrb[32].mxu1 %v2590_v3  ;;  %1989 = vmatpush3.bf16.msra.mxu0 %v2807_v38  ;;  %v479_v3 = vld [vmem:[%s3213_s1 + $0x438] sm:$0xff] }
  0x77   : > { %2026 = vmatpush3.bf16.msra.mxu1 %v2807_v38  ;;  %854 = vmatprep.mubr.f32.mxu0 %v2657_v31  ;;  %v1998_v31 = vpack.c.bf16 %v479_v3, %v478_v16 }
  0x78   : > { %999 = vmatprep.mubr.f32.mxu1 %v2697_v47  ;;  %1991 = vmatprep.subr.bf16.mxu0 %v1990_v7 }
  0x79   : > { %855 = vmatmul.mubr.f32.gmra.mrb[34].mxu0 %v2623_v18  ;;  %2019 = vmatprep.subr.bf16.mxu1 %v1990_v7  ;;  %v480_v18 = vld [vmem:[%s3213_s1 + $0x440] sm:$0xff] }
  0x7a   : > { %1000 = vmatmul.mubr.f32.gmra.mrb[34].mxu1 %v2626_v19  ;;  %859 = vmatprep.mubr.f32.mxu0 %v2694_v46  ;;  %v2002_v19 = vpack.c.bf16 %v481_v10, %v480_v18 }
  0x7b   : > { %1004 = vmatprep.mubr.f32.mxu1 %v2734_v62  ;;  %1993 = vmatpush3.bf16.msra.mxu0 %v1990_v7 }
  0x7c   : > { %2027 = vmatpush3.bf16.msra.mxu1 %v1990_v7  ;;  %1995 = vmatprep.subr.bf16.mxu0 %v1994_v2 }
  0x7d   : > { %860 = vmatmul.mubr.f32.gmra.mrb[36].mxu0 %v2660_v32  ;;  %2020 = vmatprep.subr.bf16.mxu1 %v1994_v2  ;;  %v482_v32 = vld [vmem:[%s3213_s1 + $0x450] sm:$0xff] }
  0x7e   : > { %1005 = vmatmul.mubr.f32.gmra.mrb[36].mxu1 %v2663_v33  ;;  %864 = vmatprep.mubr.f32.mxu0 %v2731_v61  ;;  %v2006_v33 = vpack.c.bf16 %v483_v11, %v482_v32 }
  0x7f   : > { %1009 = vmatprep.mubr.f32.mxu1 %v2771_v15  ;;  %1997 = vmatpush3.bf16.msra.mxu0 %v1994_v2 }
  0x80   : > { %2028 = vmatpush3.bf16.msra.mxu1 %v1994_v2  ;;  %1999 = vmatprep.subr.bf16.mxu0 %v1998_v31 }
  0x81   : > { %865 = vmatmul.mubr.f32.gmra.mrb[38].mxu0 %v2697_v47  ;;  %2021 = vmatprep.subr.bf16.mxu1 %v1998_v31  ;;  %v484_v47 = vld [vmem:[%s3213_s1 + $0x460] sm:$0xff] }
  0x82   : > { %1010 = vmatmul.mubr.f32.gmra.mrb[38].mxu1 %v2700_v48  ;;  %869 = vmatprep.mubr.f32.mxu0 %v2768_v14  ;;  %v2010_v48 = vpack.c.bf16 %v485_v12, %v484_v47 }
  0x83   : > { %1014 = vmatprep.mubr.f32.mxu1 %v2802_v34  ;;  %2001 = vmatpush3.bf16.msra.mxu0 %v1998_v31 }
  0x84   : > { %2029 = vmatpush3.bf16.msra.mxu1 %v1998_v31  ;;  %2003 = vmatprep.subr.bf16.mxu0 %v2002_v19 }
  0x85   : > { %870 = vmatmul.mubr.f32.gmra.mrb[40].mxu0 %v2734_v62  ;;  %2022 = vmatprep.subr.bf16.mxu1 %v2002_v19  ;;  %v486_v62 = vld [vmem:[%s3213_s1 + $0x470] sm:$0xff] }
  0x86   : > { %1015 = vmatmul.mubr.f32.gmra.mrb[40].mxu1 %v2737_v0  ;;  %874 = vmatprep.mubr.f32.mxu0 %v2799_v30  ;;  %v2014_v0 = vpack.c.bf16 %v487_v13, %v486_v62 }
  0x87   : > { %1019 = vmatprep.mubr.f32.mxu1 %v2817_v40  ;;  %2005 = vmatpush3.bf16.msra.mxu0 %v2002_v19 }
  0x88   : > { %2030 = vmatpush3.bf16.msra.mxu1 %v2002_v19  ;;  %2007 = vmatprep.subr.bf16.mxu0 %v2006_v33 }
  0x89   : > { %875 = vmatmul.mubr.f32.gmra.mrb[42].mxu0 %v2771_v15  ;;  %2023 = vmatprep.subr.bf16.mxu1 %v2006_v33  ;;  %v1421_v15 = vld [vmem:[%s2469_s24 + $0xc1] sm:$0xff] }
  0x8a   : > { %1020 = vmatmul.mubr.f32.gmra.mrb[42].mxu1 %v2774_v20  ;;  %879 = vmatprep.mubr.f32.mxu0 %v2814_v39  ;;  %v1422_v20 = vld [vmem:[%s2469_s24 + $0xc9] sm:$0xff] }
  0x8b   : > { %1024 = vmatprep.mubr.f32.mxu1 %v2832_v43  ;;  %2009 = vmatpush3.bf16.msra.mxu0 %v2006_v33 }
  0x8c   : > { %2031 = vmatpush3.bf16.msra.mxu1 %v2006_v33  ;;  %2011 = vmatprep.subr.bf16.mxu0 %v2010_v48 }
  0x8d   : > { %880 = vmatmul.mubr.f32.gmra.mrb[44].mxu0 %v2802_v34  ;;  %2024 = vmatprep.subr.bf16.mxu1 %v2010_v48 }
  0x8e   : > { %1025 = vmatmul.mubr.f32.gmra.mrb[44].mxu1 %v2805_v36  ;;  %884 = vmatprep.mubr.f32.mxu0 %v2829_v42 }
  0x8f   : > { %1029 = vmatprep.mubr.f32.mxu1 %v2845_v49  ;;  %2013 = vmatpush3.bf16.msra.mxu0 %v2010_v48 }
  0x90   : > { %2032 = vmatpush3.bf16.msra.mxu1 %v2010_v48  ;;  %2015 = vmatprep.subr.bf16.mxu0 %v2014_v0 }
  0x91   : > { %885 = vmatmul.mubr.f32.gmra.mrb[46].mxu0 %v2817_v40  ;;  %2025 = vmatprep.subr.bf16.mxu1 %v2014_v0 }
  0x92   : > { %1030 = vmatmul.mubr.f32.gmra.mrb[46].mxu1 %v2820_v41  ;;  %889 = vmatprep.mubr.f32.mxu0 %v2842_v45 }
  0x93   : > { %1034 = vmatprep.mubr.f32.mxu1 %v2858_v52  ;;  %2017 = vmatpush3.bf16.msra.mxu0 %v2014_v0 }
  0x94   : > { %2033 = vmatpush3.bf16.msra.mxu1 %v2014_v0 }
  0x95   : > { %890 = vmatmul.mubr.f32.gmra.mrb[48].mxu0 %v2832_v43 }
  0x96   : > { %1035 = vmatmul.mubr.f32.gmra.mrb[48].mxu1 %v2835_v44  ;;  %894 = vmatprep.mubr.f32.mxu0 %v2855_v51 }
  0x97   : > { %1039 = vmatprep.mubr.f32.mxu1 %v2871_v55 }
  0x99   : > { %895 = vmatmul.mubr.f32.gmra.mrb[50].mxu0 %v2845_v49 }
  0x9a   : > { %1040 = vmatmul.mubr.f32.gmra.mrb[50].mxu1 %v2848_v50  ;;  %899 = vmatprep.mubr.f32.mxu0 %v2868_v54 }
  0x9b   : > { %1044 = vmatprep.mubr.f32.mxu1 %v2884_v58 }
  0x9d   : > { %900 = vmatmul.mubr.f32.gmra.mrb[52].mxu0 %v2858_v52 }
  0x9e   : > { %1045 = vmatmul.mubr.f32.gmra.mrb[52].mxu1 %v2861_v53  ;;  %904 = vmatprep.mubr.f32.mxu0 %v2881_v57 }
  0x9f   : > { %1049 = vmatprep.mubr.f32.mxu1 %v2897_v63 }
  0xa1   : > { %905 = vmatmul.mubr.f32.gmra.mrb[54].mxu0 %v2871_v55 }
  0xa2   : > { %1050 = vmatmul.mubr.f32.gmra.mrb[54].mxu1 %v2874_v56  ;;  %909 = vmatprep.mubr.f32.mxu0 %v2894_v60 }
  0xa3   : > { %1054 = vmatprep.mubr.f32.mxu1 %v1421_v15 }
  0xa5   : > { %910 = vmatmul.mubr.f32.gmra.mrb[56].mxu0 %v2884_v58 }
  0xa6   : > { %1055 = vmatmul.mubr.f32.gmra.mrb[56].mxu1 %v2887_v59  ;;  %914 = vmatprep.mubr.f32.mxu0 %v2907_v4 }
  0xa7   : > { %1059 = vmatprep.mubr.f32.mxu1 %v1422_v20 }
  0xa9   : > { %915 = vmatmul.mubr.f32.gmra.mrb[58].mxu0 %v2897_v63 }
  0xaa   : > { %1060 = vmatmul.mubr.f32.gmra.mrb[58].mxu1 %v2900_v1  ;;  %919 = vmatprep.mubr.f32.mxu0 %v1391_v21 }
  0xab   : > { %1064 = vmatprep.mubr.f32.mxu1 %v1423_v22 }
  0xad   : > { %920 = vmatmul.mubr.f32.gmra.mrb[60].mxu0 %v1421_v15 }
  0xae   : > { %1065 = vmatmul.mubr.f32.gmra.mrb[60].mxu1 %v1407_v23  ;;  %924 = vmatprep.mubr.f32.mxu0 %v1392_v24 }
  0xaf   : > { %1069 = vmatprep.mubr.f32.mxu1 %v1424_v25 }
  0xb1   : > { %925 = vmatmul.mubr.f32.gmra.mrb[62].mxu0 %v1422_v20 }
  0xb2   : > { %1070 = vmatmul.mubr.f32.gmra.mrb[62].mxu1 %v1408_v26  ;;  %1834 = vmatprep.mubr.f32.mxu0 %v2694_v46  ;;  %v1440_v46 = vld [vmem:[%s2469_s24 + $0xe2] sm:$0xff]  ;;  %s185_s24 = sand.u32 1, %s2179_s13  }
  0xb3   : > { %1846 = vmatprep.mubr.f32.mxu1 %v2868_v54  ;;  %s1343_s6 = sshll.u32 %s185_s24, 7  ;;  %s3160_s11 = scalar_lea.sflag [#allocation3], %s185_s24 }
  0xb4   : > { %s3123_s7 = scalar_lea.vmem [#allocation2], %s1343_s6 }
  0xb5   : > { %1835 = vmatmul.mubr.f32.vlgmr.msra.gmra.mrb[64].mxu0 %v2731_v61  ;;  %s1253_s16 = sshll.u32 %s3123_s7, 4  ;;  %s3152_s16 = int_to_ptr.vmem [resolvable:$true] %s1253_s16 }
  0xb6   : > { %1847 = vmatmul.mubr.f32.vlgmr.msra.gmra.mrb[64].mxu1 %v2881_v57  ;;  %1837 = vmatprep.mubr.f32.mxu0 %v2768_v14  ;;  %s2109_s29 = scalar_lea.vmem %s3152_s16, 2048  ;;  %p2116_p4 = scmp.lt.s32.totalorder %s3152_s16, %s2114_s21 }
  0xb7   : > { %1849 = vmatprep.mubr.f32.mxu1 %v2894_v60  ;;  %p2110_p0 = scmp.ne.s32.totalorder %s3152_s16, %s2109_s29  ;;  %p2117_p5 = scmp.lt.s32.totalorder %s2115_s28, %s2109_s29 }
  0xb9   : > { %1838 = vmatmul.mubr.f32.gmra.mrb[66].mxu0 %v2799_v30  ;;  %p2111_p1 = pnand %p2110_p0, %p2279_p3  ;;  %p2118_p6 = por %p2117_p5, %p2116_p4 }
  0xba   : > { %1850 = vmatmul.mubr.f32.gmra.mrb[66].mxu1 %v2907_v4  ;;  %1840 = vmatprep.mubr.f32.mxu0 %v2814_v39 }
  0xbb   : > { %1852 = vmatprep.mubr.f32.mxu1 %v1391_v21  ;;  %p2112_p2 = pneg %p2111_p1 }
  0xbd   : > { %1841 = vmatmul.mubr.f32.gmra.mrb[68].mxu0 %v2829_v42  ;;  %p2119_p7 = pnand %p2118_p6, %p2112_p2 }
  0xbe   : > { %1853 = vmatmul.mubr.f32.gmra.mrb[68].mxu1 %v1392_v24  ;;  %1843 = vmatprep.mubr.f32.mxu0 %v2842_v45 }
  0xbf   : > { %1855 = vmatprep.mubr.f32.mxu1 %v1439_v27 }
  0xc1   : > { %1844 = vmatmul.mubr.f32.gmra.mrb[70].mxu0 %v2855_v51 }
  0xc2   : > { %1856 = vmatmul.mubr.f32.gmra.mrb[70].mxu1 %v1440_v46 }
 0x108   : > { %v1482_v61 = vpop.f32.mrb[0].mxu0 }
 0x109   : > { %v1562_v14 = vpop.f32.mrb[0].mxu1  ;;  %v1483_v29 = vpop.f32.mrb[1].mxu0 }
 0x10a   : > { %v1484_v17 = vadd.f32 %v1483_v29, %v1482_v61  ;;  %v1563_v30 = vpop.f32.mrb[1].mxu1 }
 0x10b   : > { %v1564_v34 = vadd.f32 %v1563_v30, %v1562_v14 }
 0x10c   : > { %v562_v35 = vadd.f32 %v1484_v17, %v3034_v28  ;;  %v1485_v36 = vpop.f32.mrb[2].mxu0 }
 0x10d   : > { %v1565_v37 = vpop.f32.mrb[2].mxu1  ;;  %v1486_v38 = vpop.f32.mrb[3].mxu0 }
 0x10e   : > { %v3037_v39 = vadd.f32 %v1564_v34, %v562_v35  ;;  %v1487_v40 = vadd.f32 %v1486_v38, %v1485_v36  ;;  %v1566_v41 = vpop.f32.mrb[3].mxu1 }
 0x10f   : > { %v1567_v42 = vadd.f32 %v1566_v41, %v1565_v37 }
 0x110   : > { %v567_v43 = vadd.f32 %v1487_v40, %v3034_v28  ;;  %v1488_v44 = vpop.f32.mrb[4].mxu0 }
 0x111   : > { %v1568_v45 = vpop.f32.mrb[4].mxu1  ;;  %v1489_v49 = vpop.f32.mrb[5].mxu0 }
 0x112   : > { %v3040_v50 = vadd.f32 %v1567_v42, %v567_v43  ;;  %v1490_v51 = vadd.f32 %v1489_v49, %v1488_v44  ;;  %v1569_v52 = vpop.f32.mrb[5].mxu1 }
 0x113   : > { %v1570_v53 = vadd.f32 %v1569_v52, %v1568_v45 }
 0x114   : > { %v572_v54 = vadd.f32 %v1490_v51, %v3034_v28  ;;  %v1491_v55 = vpop.f32.mrb[6].mxu0 }
 0x115   : > { %v1571_v56 = vpop.f32.mrb[6].mxu1  ;;  %v1492_v57 = vpop.f32.mrb[7].mxu0 }
 0x116   : > { %v3043_v58 = vadd.f32 %v1570_v53, %v572_v54  ;;  %v1493_v59 = vadd.f32 %v1492_v57, %v1491_v55  ;;  %v1572_v60 = vpop.f32.mrb[7].mxu1 }
 0x117   : > { %v1573_v63 = vadd.f32 %v1572_v60, %v1571_v56 }
 0x118   : > { %v577_v1 = vadd.f32 %v1493_v59, %v3034_v28  ;;  %v1494_v4 = vpop.f32.mrb[8].mxu0 }
 0x119   : > { %v1574_v5 = vpop.f32.mrb[8].mxu1  ;;  %v1495_v6 = vpop.f32.mrb[9].mxu0 }
 0x11a   : > { %v3046_v7 = vadd.f32 %v1573_v63, %v577_v1  ;;  %v1496_v8 = vadd.f32 %v1495_v6, %v1494_v4  ;;  %v1575_v9 = vpop.f32.mrb[9].mxu1 }
 0x11b   : > { %v1576_v2 = vadd.f32 %v1575_v9, %v1574_v5 }
 0x11c   : > { %v582_v16 = vadd.f32 %v1496_v8, %v3034_v28  ;;  %v1497_v3 = vpop.f32.mrb[10].mxu0 }
 0x11d   : > { %v1577_v31 = vpop.f32.mrb[10].mxu1  ;;  %v1498_v18 = vpop.f32.mrb[11].mxu0 }
 0x11e   : > { %v3049_v10 = vadd.f32 %v1576_v2, %v582_v16  ;;  %v1499_v19 = vadd.f32 %v1498_v18, %v1497_v3  ;;  %v1578_v32 = vpop.f32.mrb[11].mxu1 }
 0x11f   : > { %v1579_v11 = vadd.f32 %v1578_v32, %v1577_v31 }
 0x120   : > { %v587_v33 = vadd.f32 %v1499_v19, %v3034_v28  ;;  %v1500_v47 = vpop.f32.mrb[12].mxu0 }
 0x121   : > { %v1580_v12 = vpop.f32.mrb[12].mxu1  ;;  %v1501_v48 = vpop.f32.mrb[13].mxu0 }
 0x122   : > { %v3052_v62 = vadd.f32 %v1579_v11, %v587_v33  ;;  %v1502_v13 = vadd.f32 %v1501_v48, %v1500_v47  ;;  %v1581_v0 = vpop.f32.mrb[13].mxu1 }
 0x123   : > { %v1582_v15 = vadd.f32 %v1581_v0, %v1580_v12 }
 0x124   : > { %v592_v20 = vadd.f32 %v1502_v13, %v3034_v28  ;;  %v1503_v21 = vpop.f32.mrb[14].mxu0 }
 0x125   : > { %v1583_v22 = vpop.f32.mrb[14].mxu1  ;;  %v1504_v23 = vpop.f32.mrb[15].mxu0 }
 0x126   : > { %v3055_v24 = vadd.f32 %v1582_v15, %v592_v20  ;;  %v1505_v25 = vadd.f32 %v1504_v23, %v1503_v21  ;;  %v1584_v26 = vpop.f32.mrb[15].mxu1 }
 0x127   : > { %v1585_v27 = vadd.f32 %v1584_v26, %v1583_v22 }
 0x128   : > { %v597_v46 = vadd.f32 %v1505_v25, %v3034_v28  ;;  %v1506_v61 = vpop.f32.mrb[16].mxu0 }
 0x129   : > { %v1586_v14 = vpop.f32.mrb[16].mxu1  ;;  %v1507_v29 = vpop.f32.mrb[17].mxu0 }
 0x12a   : > { %v3058_v17 = vadd.f32 %v1585_v27, %v597_v46  ;;  %v1508_v30 = vadd.f32 %v1507_v29, %v1506_v61  ;;  %v1587_v34 = vpop.f32.mrb[17].mxu1 }
 0x12b   : > { %v1588_v35 = vadd.f32 %v1587_v34, %v1586_v14 }
 0x12c   : > { %v602_v36 = vadd.f32 %v1508_v30, %v3034_v28  ;;  %v1509_v37 = vpop.f32.mrb[18].mxu0 }
 0x12d   : > { %v1589_v38 = vpop.f32.mrb[18].mxu1  ;;  %v1510_v40 = vpop.f32.mrb[19].mxu0 }
 0x12e   : > { %v3061_v41 = vadd.f32 %v1588_v35, %v602_v36  ;;  %v1511_v42 = vadd.f32 %v1510_v40, %v1509_v37  ;;  %v1590_v43 = vpop.f32.mrb[19].mxu1 }
 0x12f   : > { %v1591_v44 = vadd.f32 %v1590_v43, %v1589_v38 }
 0x130   : > { %v607_v45 = vadd.f32 %v1511_v42, %v3034_v28  ;;  %v1512_v49 = vpop.f32.mrb[20].mxu0 }
 0x131   : > { %v1592_v51 = vpop.f32.mrb[20].mxu1  ;;  %v1513_v52 = vpop.f32.mrb[21].mxu0 }
 0x132   : > { %v3064_v53 = vadd.f32 %v1591_v44, %v607_v45  ;;  %v1514_v54 = vadd.f32 %v1513_v52, %v1512_v49  ;;  %v1593_v55 = vpop.f32.mrb[21].mxu1 }
 0x133   : > { %v1594_v56 = vadd.f32 %v1593_v55, %v1592_v51 }
 0x134   : > { %v612_v57 = vadd.f32 %v1514_v54, %v3034_v28  ;;  %v1515_v59 = vpop.f32.mrb[22].mxu0 }
 0x135   : > { %v1595_v60 = vpop.f32.mrb[22].mxu1  ;;  %v1516_v63 = vpop.f32.mrb[23].mxu0 }
 0x136   : > { %v3067_v1 = vadd.f32 %v1594_v56, %v612_v57  ;;  %v1517_v4 = vadd.f32 %v1516_v63, %v1515_v59  ;;  %v1596_v5 = vpop.f32.mrb[23].mxu1 }
 0x137   : > { %v1597_v6 = vadd.f32 %v1596_v5, %v1595_v60 }
 0x138   : > { %v617_v8 = vadd.f32 %v1517_v4, %v3034_v28  ;;  %v1518_v9 = vpop.f32.mrb[24].mxu0 }
 0x139   : > { %v1598_v2 = vpop.f32.mrb[24].mxu1  ;;  %v1519_v16 = vpop.f32.mrb[25].mxu0 }
 0x13a   : > { %v3070_v3 = vadd.f32 %v1597_v6, %v617_v8  ;;  %v1520_v31 = vadd.f32 %v1519_v16, %v1518_v9  ;;  %v1599_v18 = vpop.f32.mrb[25].mxu1 }
 0x13b   : > { %v1600_v19 = vadd.f32 %v1599_v18, %v1598_v2 }
 0x13c   : > { %v622_v32 = vadd.f32 %v1520_v31, %v3034_v28  ;;  %v1521_v11 = vpop.f32.mrb[26].mxu0 }
 0x13d   : > { %v1601_v33 = vpop.f32.mrb[26].mxu1  ;;  %v1522_v47 = vpop.f32.mrb[27].mxu0 }
 0x13e   : > { %v3073_v12 = vadd.f32 %v1600_v19, %v622_v32  ;;  %v1523_v48 = vadd.f32 %v1522_v47, %v1521_v11  ;;  %v1602_v13 = vpop.f32.mrb[27].mxu1 }
 0x13f   : > { %v1603_v0 = vadd.f32 %v1602_v13, %v1601_v33 }
 0x140   : > { %v627_v15 = vadd.f32 %v1523_v48, %v3034_v28  ;;  %v1524_v20 = vpop.f32.mrb[28].mxu0 }
 0x141   : > { %v1604_v21 = vpop.f32.mrb[28].mxu1  ;;  %v1525_v22 = vpop.f32.mrb[29].mxu0 }
 0x142   : > { %v3076_v23 = vadd.f32 %v1603_v0, %v627_v15  ;;  %v1526_v25 = vadd.f32 %v1525_v22, %v1524_v20  ;;  %v1605_v26 = vpop.f32.mrb[29].mxu1 }
 0x143   : > { %v1606_v27 = vadd.f32 %v1605_v26, %v1604_v21 }
 0x144   : > { %v632_v46 = vadd.f32 %v1526_v25, %v3034_v28  ;;  %v1527_v61 = vpop.f32.mrb[30].mxu0 }
 0x145   : > { %v1607_v14 = vpop.f32.mrb[30].mxu1  ;;  %v1528_v29 = vpop.f32.mrb[31].mxu0 }
 0x146   : > { %v3079_v30 = vadd.f32 %v1606_v27, %v632_v46  ;;  %v1529_v34 = vadd.f32 %v1528_v29, %v1527_v61  ;;  %v1608_v35 = vpop.f32.mrb[31].mxu1 }
 0x147   : > { %v1609_v36 = vadd.f32 %v1608_v35, %v1607_v14 }
 0x148   : > { %v637_v37 = vadd.f32 %v1529_v34, %v3034_v28  ;;  %v1642_v38 = vpop.f32.mrb[32].mxu0 }
 0x149   : > { %v1722_v40 = vpop.f32.mrb[32].mxu1  ;;  %v1643_v42 = vpop.f32.mrb[33].mxu0 }
 0x14a   : > { %v3082_v43 = vadd.f32 %v1609_v36, %v637_v37  ;;  %v1644_v44 = vadd.f32 %v1643_v42, %v1642_v38  ;;  %v1723_v45 = vpop.f32.mrb[33].mxu1 }
 0x14b   : > { %v1724_v49 = vadd.f32 %v1723_v45, %v1722_v40 }
 0x14c   : > { %v852_v51 = vadd.f32 %v1644_v44, %v3037_v39  ;;  %v1645_v52 = vpop.f32.mrb[34].mxu0 }
 0x14d   : > { %v1725_v54 = vpop.f32.mrb[34].mxu1  ;;  %v1646_v55 = vpop.f32.mrb[35].mxu0 }
 0x14e   : > { %v1647_v56 = vadd.f32 %v1646_v55, %v1645_v52  ;;  %v1726_v57 = vpop.f32.mrb[35].mxu1  ;;  %v3085_v59 = vadd.f32 %v1724_v49, %v852_v51 }
 0x14f   : > { %v1727_v60 = vadd.f32 %v1726_v57, %v1725_v54 }
 0x150   : > { %v857_v28 = vadd.f32 %v1647_v56, %v3040_v50  ;;  %v1648_v63 = vpop.f32.mrb[36].mxu0 }
 0x151   : > { %v1728_v4 = vpop.f32.mrb[36].mxu1  ;;  %v1649_v5 = vpop.f32.mrb[37].mxu0 }
 0x152   : > { %v1650_v6 = vadd.f32 %v1649_v5, %v1648_v63  ;;  %v1729_v8 = vpop.f32.mrb[37].mxu1  ;;  %v3088_v9 = vadd.f32 %v1727_v60, %v857_v28 }
 0x153   : > { %v1730_v2 = vadd.f32 %v1729_v8, %v1728_v4 }
 0x154   : > { %v862_v39 = vadd.f32 %v1650_v6, %v3043_v58  ;;  %v1651_v16 = vpop.f32.mrb[38].mxu0 }
 0x155   : > { %v1731_v31 = vpop.f32.mrb[38].mxu1  ;;  %v1652_v18 = vpop.f32.mrb[39].mxu0 }
 0x156   : > { %v1653_v19 = vadd.f32 %v1652_v18, %v1651_v16  ;;  %v1732_v32 = vpop.f32.mrb[39].mxu1  ;;  %v3091_v11 = vadd.f32 %v1730_v2, %v862_v39 }
 0x157   : > { %v1733_v33 = vadd.f32 %v1732_v32, %v1731_v31 }
 0x158   : > { %v867_v50 = vadd.f32 %v1653_v19, %v3046_v7  ;;  %v1654_v47 = vpop.f32.mrb[40].mxu0 }
 0x159   : > { %v1734_v48 = vpop.f32.mrb[40].mxu1  ;;  %v1655_v13 = vpop.f32.mrb[41].mxu0 }
 0x15a   : > { %v1656_v0 = vadd.f32 %v1655_v13, %v1654_v47  ;;  %v1735_v15 = vpop.f32.mrb[41].mxu1  ;;  %v3094_v20 = vadd.f32 %v1733_v33, %v867_v50 }
 0x15b   : > { %v1736_v21 = vadd.f32 %v1735_v15, %v1734_v48 }
 0x15c   : > { %v872_v58 = vadd.f32 %v1656_v0, %v3049_v10  ;;  %v1657_v22 = vpop.f32.mrb[42].mxu0 }
 0x15d   : > { %v1737_v25 = vpop.f32.mrb[42].mxu1  ;;  %v1658_v26 = vpop.f32.mrb[43].mxu0 }
 0x15e   : > { %v1659_v27 = vadd.f32 %v1658_v26, %v1657_v22  ;;  %v1738_v46 = vpop.f32.mrb[43].mxu1  ;;  %v3097_v61 = vadd.f32 %v1736_v21, %v872_v58 }
 0x15f   : > { %v1739_v14 = vadd.f32 %v1738_v46, %v1737_v25 }
 0x160   : > { %v877_v7 = vadd.f32 %v1659_v27, %v3052_v62  ;;  %v1660_v29 = vpop.f32.mrb[44].mxu0 }
 0x161   : > { %v1740_v34 = vpop.f32.mrb[44].mxu1  ;;  %v1661_v35 = vpop.f32.mrb[45].mxu0 }
 0x162   : > { %v1662_v36 = vadd.f32 %v1661_v35, %v1660_v29  ;;  %v1741_v37 = vpop.f32.mrb[45].mxu1  ;;  %v3100_v38 = vadd.f32 %v1739_v14, %v877_v7 }
 0x163   : > { %v1742_v40 = vadd.f32 %v1741_v37, %v1740_v34 }
 0x164   : > { %v882_v10 = vadd.f32 %v1662_v36, %v3055_v24  ;;  %v1663_v42 = vpop.f32.mrb[46].mxu0 }
 0x165   : > { %v1743_v44 = vpop.f32.mrb[46].mxu1  ;;  %v1664_v45 = vpop.f32.mrb[47].mxu0 }
 0x166   : > { %v1665_v49 = vadd.f32 %v1664_v45, %v1663_v42  ;;  %v1744_v51 = vpop.f32.mrb[47].mxu1  ;;  %v3103_v52 = vadd.f32 %v1742_v40, %v882_v10 }
 0x167   : > { %v1745_v54 = vadd.f32 %v1744_v51, %v1743_v44 }
 0x168   : > { %v887_v62 = vadd.f32 %v1665_v49, %v3058_v17  ;;  %v1666_v55 = vpop.f32.mrb[48].mxu0 }
 0x169   : > { %v1746_v56 = vpop.f32.mrb[48].mxu1  ;;  %v1667_v57 = vpop.f32.mrb[49].mxu0 }
 0x16a   : > { %v1668_v60 = vadd.f32 %v1667_v57, %v1666_v55  ;;  %v1747_v28 = vpop.f32.mrb[49].mxu1  ;;  %v3106_v63 = vadd.f32 %v1745_v54, %v887_v62 }
 0x16b   : > { %v1748_v4 = vadd.f32 %v1747_v28, %v1746_v56 }
 0x16c   : > { %v892_v24 = vadd.f32 %v1668_v60, %v3061_v41  ;;  %v1669_v5 = vpop.f32.mrb[50].mxu0 }
 0x16d   : > { %v1749_v6 = vpop.f32.mrb[50].mxu1  ;;  %v1670_v8 = vpop.f32.mrb[51].mxu0 }
 0x16e   : > { %v1671_v2 = vadd.f32 %v1670_v8, %v1669_v5  ;;  %v1750_v39 = vpop.f32.mrb[51].mxu1  ;;  %v3109_v16 = vadd.f32 %v1748_v4, %v892_v24 }
 0x16f   : > { %v1751_v31 = vadd.f32 %v1750_v39, %v1749_v6 }
 0x170   : > { %v897_v17 = vadd.f32 %v1671_v2, %v3064_v53  ;;  %v1672_v18 = vpop.f32.mrb[52].mxu0 }
 0x171   : > { %v1752_v19 = vpop.f32.mrb[52].mxu1  ;;  %v1673_v32 = vpop.f32.mrb[53].mxu0 }
 0x172   : > { %v1674_v33 = vadd.f32 %v1673_v32, %v1672_v18  ;;  %v1753_v50 = vpop.f32.mrb[53].mxu1  ;;  %v1042_v47 = vadd.f32 %v1751_v31, %v897_v17 }
 0x173   : > { %v1754_v48 = vadd.f32 %v1753_v50, %v1752_v19 }
 0x174   : > { %v902_v13 = vadd.f32 %v1674_v33, %v3067_v1  ;;  %v1675_v41 = vpop.f32.mrb[54].mxu0 }
 0x175   : > { %v1755_v0 = vpop.f32.mrb[54].mxu1  ;;  %v1676_v15 = vpop.f32.mrb[55].mxu0 }
 0x176   : > { %v1677_v21 = vadd.f32 %v1676_v15, %v1675_v41  ;;  %v1756_v58 = vpop.f32.mrb[55].mxu1  ;;  %v1047_v22 = vadd.f32 %v1754_v48, %v902_v13 }
 0x177   : > { %v1757_v25 = vadd.f32 %v1756_v58, %v1755_v0 }
 0x178   : > { %v907_v26 = vadd.f32 %v1677_v21, %v3070_v3  ;;  %v1678_v27 = vpop.f32.mrb[56].mxu0 }
 0x179   : > { %v1758_v53 = vpop.f32.mrb[56].mxu1  ;;  %v1679_v46 = vpop.f32.mrb[57].mxu0 }
 0x17a   : > { %v1680_v14 = vadd.f32 %v1679_v46, %v1678_v27  ;;  %v1759_v7 = vpop.f32.mrb[57].mxu1  ;;  %v1052_v29 = vadd.f32 %v1757_v25, %v907_v26 }
 0x17b   : > { %v1760_v34 = vadd.f32 %v1759_v7, %v1758_v53 }
 0x17c   : > { %v912_v35 = vadd.f32 %v1680_v14, %v3073_v12  ;;  %v1681_v1 = vpop.f32.mrb[58].mxu0 }
 0x17d   : > { %v1761_v36 = vpop.f32.mrb[58].mxu1  ;;  %v1682_v37 = vpop.f32.mrb[59].mxu0 }
 0x17e   : > { %v1683_v40 = vadd.f32 %v1682_v37, %v1681_v1  ;;  %v1762_v10 = vpop.f32.mrb[59].mxu1  ;;  %v1057_v42 = vadd.f32 %v1760_v34, %v912_v35 }
 0x17f   : > { %v1763_v44 = vadd.f32 %v1762_v10, %v1761_v36 }
 0x180   : > { %v917_v3 = vadd.f32 %v1683_v40, %v3076_v23  ;;  %v1684_v45 = vpop.f32.mrb[60].mxu0 }
 0x181   : > { %v1764_v49 = vpop.f32.mrb[60].mxu1  ;;  %v1685_v51 = vpop.f32.mrb[61].mxu0 }
 0x182   : > { %v1686_v54 = vadd.f32 %v1685_v51, %v1684_v45  ;;  %v1765_v62 = vpop.f32.mrb[61].mxu1  ;;  %v1062_v55 = vadd.f32 %v1763_v44, %v917_v3 }
 0x183   : > { %v1766_v56 = vadd.f32 %v1765_v62, %v1764_v49 }
 0x184   : > { %v922_v12 = vadd.f32 %v1686_v54, %v3079_v30  ;;  %v1687_v57 = vpop.f32.mrb[62].mxu0 }
 0x185   : > { %v1767_v60 = vpop.f32.mrb[62].mxu1  ;;  %v1688_v28 = vpop.f32.mrb[63].mxu0 }
 0x186   : > { %v1689_v4 = vadd.f32 %v1688_v28, %v1687_v57  ;;  %v1768_v24 = vpop.f32.mrb[63].mxu1  ;;  %v1067_v5 = vadd.f32 %v1766_v56, %v922_v12 }
 0x187   : > { %v1769_v6 = vadd.f32 %v1768_v24, %v1767_v60 }
 0x188   : > { %v927_v23 = vadd.f32 %v1689_v4, %v3082_v43  ;;  %v1836_v8 = vpop.f32.mrb[64].mxu0 }
 0x189   : > { %v1147_v2 = vadd.f32 %v1836_v8, %v3088_v9  ;;  %v1848_v39 = vpop.f32.mrb[64].mxu1  ;;  %v1141_v31 = vpop.f32.mrb[65].mxu0 }
 0x18a   : > { %v1187_v17 = vadd.f32 %v1848_v39, %v1042_v47  ;;  %v1142_v30 = vadd.f32 %v1141_v31, %v3085_v59  ;;  %v1181_v18 = vpop.f32.mrb[65].mxu1  ;;  %v1072_v19 = vadd.f32 %v1769_v6, %v927_v23 }
 0x18b   : > { %1221 = vst [vmem:[%s3123_s7 + $0x8] sm:$0xff] %v1147_v2  ;;  %v1182_v43 = vadd.f32 %v1181_v18, %v3109_v16 }
 0x18c   : > { %1229 = vst [vmem:[%s3123_s7 + $0x48] sm:$0xff] %v1187_v17  ;;  %1220 = vst [vmem:[%s3123_s7] sm:$0xff] %v1142_v30  ;;  %v1839_v9 = vpop.f32.mrb[66].mxu0 }
 0x18d   : > { %1228 = vst [vmem:[%s3123_s7 + $0x40] sm:$0xff] %v1182_v43  ;;  %v1157_v59 = vadd.f32 %v1839_v9, %v3094_v20  ;;  %v1851_v32 = vpop.f32.mrb[66].mxu1  ;;  %v1151_v33 = vpop.f32.mrb[67].mxu0 }
 0x18e   : > { %v1197_v50 = vadd.f32 %v1851_v32, %v1052_v29  ;;  %v1152_v47 = vadd.f32 %v1151_v33, %v3091_v11  ;;  %v1191_v48 = vpop.f32.mrb[67].mxu1 }
 0x18f   : > { %1223 = vst [vmem:[%s3123_s7 + $0x18] sm:$0xff] %v1157_v59  ;;  %v1192_v16 = vadd.f32 %v1191_v48, %v1047_v22 }
 0x190   : > { %1231 = vst [vmem:[%s3123_s7 + $0x58] sm:$0xff] %v1197_v50  ;;  %1222 = vst [vmem:[%s3123_s7 + $0x10] sm:$0xff] %v1152_v47  ;;  %v1842_v13 = vpop.f32.mrb[68].mxu0 }
 0x191   : > { %1230 = vst [vmem:[%s3123_s7 + $0x50] sm:$0xff] %v1192_v16  ;;  %v1167_v20 = vadd.f32 %v1842_v13, %v3100_v38  ;;  %v1854_v41 = vpop.f32.mrb[68].mxu1  ;;  %v1161_v0 = vpop.f32.mrb[69].mxu0 }
 0x192   : > { %v1207_v15 = vadd.f32 %v1854_v41, %v1062_v55  ;;  %v1162_v21 = vadd.f32 %v1161_v0, %v3097_v61  ;;  %v1201_v11 = vpop.f32.mrb[69].mxu1 }
 0x193   : > { %1225 = vst [vmem:[%s3123_s7 + $0x28] sm:$0xff] %v1167_v20  ;;  %v1202_v58 = vadd.f32 %v1201_v11, %v1057_v42 }
 0x194   : > { %1233 = vst [vmem:[%s3123_s7 + $0x68] sm:$0xff] %v1207_v15  ;;  %1224 = vst [vmem:[%s3123_s7 + $0x20] sm:$0xff] %v1162_v21  ;;  %v1845_v22 = vpop.f32.mrb[70].mxu0 }
 0x195   : > { %1232 = vst [vmem:[%s3123_s7 + $0x60] sm:$0xff] %v1202_v58  ;;  %v1177_v38 = vadd.f32 %v1845_v22, %v3106_v63  ;;  %v1857_v25 = vpop.f32.mrb[70].mxu1  ;;  %v1171_v26 = vpop.f32.mrb[71].mxu0 }
 0x196   : > { %v1217_v61 = vadd.f32 %v1857_v25, %v1072_v19  ;;  %v1172_v27 = vadd.f32 %v1171_v26, %v3103_v52  ;;  %v1211_v53 = vpop.f32.mrb[71].mxu1 }
 0x197   : > { %1227 = vst [vmem:[%s3123_s7 + $0x38] sm:$0xff] %v1177_v38  ;;  %v1212_v46 = vadd.f32 %v1211_v53, %v1067_v5 }
 0x198   : > { %1235 = vst [vmem:[%s3123_s7 + $0x78] sm:$0xff] %v1217_v61  ;;  %1226 = vst [vmem:[%s3123_s7 + $0x30] sm:$0xff] %v1172_v27 }
 0x199   : > { %1234 = vst [vmem:[%s3123_s7 + $0x70] sm:$0xff] %v1212_v46 }
 0x19a   : > { %2122 = shalt.err (!%p2119_p7)
}
 0x19b   : > { %s2123_s24 = scalar_lea.hbm %s3150_s10, 2048  ;;  %s2127_s4 = scalar_lea.hbm %s3215_s3, 8192 }
 0x19c   : > { %p2124_p9 = scmp.ne.s32.totalorder %s3150_s10, %s2123_s24  ;;  %p2128_p12 = scmp.lt.u32.totalorder %s3150_s10, %s3215_s3 }
 0x19d   : > { %p2129_p13 = scmp.lt.u32.totalorder %s2127_s4, %s2123_s24  ;;  %p2131_p1 = scmp.lt.u32.totalorder %s2123_s24, %s3150_s10 }
 0x19e   : > { %p2125_p10 = pnand %p2124_p9, %p2279_p3 }
 0x19f   : > { %p2130_p0 = por %p2129_p13, %p2128_p12 }
 0x1a0   : > { %p2126_p11 = pneg %p2125_p10 }
 0x1a1   : > { %p2132_p2 = por %p2131_p1, %p2130_p0 }
 0x1a3   : > { %p2133_p4 = pnand %p2132_p2, %p2126_p11 }
 0x1a5   : > { %2136 = shalt.err (!%p2133_p4)
}
 0x1a6   : > { %s2206_s15 = smov 128   ;;  %s2207_s27 = smov 8  }
 0x1a7   : > { %2036 = dma.vmem_to_hbm [thread:$0]  (%p2279_p3), %s3152_s16, 2048, %s3150_s10, %s3160_s11, %s2206_s15, %s2206_s15, %s2207_s27  }
 0x1a8 PF: > { %p2042_p5 = scmp.ge.s32.totalorder %s2203_s19, 2  ;;  %s1268_s9 = sand.u32 1, %s2175_s12  }
 0x1a9   : > { %s1269_s29 = scalar_lea.sflag [#allocation3], %s1268_s9 }
 0x1aa   : > { %p2039_p6 = pnand %p2042_p5, %p2288_p8 }
 0x1ac   : > { %2170 = dma.done.wait (!%p2039_p6), %s1269_s29, 2048  }
 0x1ad   : > { %2172 = vsyncadd (!%p2039_p6), %s1269_s29, 4294965248  ;;  %s16_s19 = sadd.s32 1, %s2203_s19   ;;  %s3218_s12 = smov %s2179_s13 }
 0x1ae   : > { %p13_p7 = scmp.ge.s32.totalorder %s16_s19, 6   ;;  %s3219_s13 = smov %s2183_s14 }
 0x1af   : > { %s3220_s14 = smov %s2297_s30  ;;  %s3221_s15 = smov %s2195_s17 }
 0x1b0   : > { %s3222_s16 = smov %s2199_s18  ;;  %s3223_s17 = smov %s3226_s22 }
 0x1b1   : > { %s3224_s18 = smov %s3230_s23  ;;  %15 = sbr.rel (!%p13_p7) target bundleno = 5 (0x5), region = 69 }
 0x1b8   :  { %1274 = vsyncpa [#allocation3], 1 }
 0x1b9   :  { %1276 = vsyncpa [#allocation3 + $0x1], 1 }

</bundles_post_ra>
